<compile_context>
chip_gen: v7x
topology: tpu7x:2x2x1
jax: 0.10.0
libtpu: 0.0.40
codegen_flags: <defaults>
</compile_context>

<pallas_src>
import jax
import jax.numpy as jnp
import numpy as np
from jax import lax
from jax.experimental import pallas as pl
from jax.experimental.pallas import tpu as pltpu


# ------------------------------ Pallas kernel ------------------------------- #

def context_block_kernel(x_ref, cmatT_ref, bdiag_ref, smat_ref, bn_ref, o_ref):
    """Fused ChannelGate + SpatialGate for a block of NB batch elements.

    x_ref:     (NB, C, HW)  native dtype (f32 or bf16) activations
    cmatT_ref: (C, C)       bf16  transposed (conv1d(k=3) ∘ 1x1-conv) channel map
    bdiag_ref: (NB, NB*C)   bf16  block-diagonal 1x1 spatial-conv weights
    smat_ref:  (HW, HW)     bf16  banded 7x7 spatial-conv matrix, BN scale folded
    bn_ref:    (1,)   SMEM  f32   BatchNorm shift (eval mode)
    o_ref:     (NB, C, HW)  same dtype as x
    """
    nb, c, hw = x_ref.shape
    x = x_ref[...]
    xf = x.astype(jnp.float32)

    # ---- ChannelGate (pool-first; 1x1-conv + conv1d pre-composed) ----------
    xm = jnp.mean(xf, axis=2)                                        # (NB, C)
    e = jnp.dot(xm.astype(jnp.bfloat16), cmatT_ref[...],
                preferred_element_type=jnp.float32)                  # (NB, C)
    cscale = jax.nn.sigmoid(e)                                       # (NB, C)

    # ---- SpatialGate (lane-dense (NB, HW) intermediates) -------------------
    x2 = xf.reshape(nb * c, hw).astype(jnp.bfloat16)                 # free relayout
    f1 = jnp.dot(bdiag_ref[...], x2,
                 preferred_element_type=jnp.float32)                 # (NB, HW)
    y = jnp.dot(f1.astype(jnp.bfloat16), smat_ref[...],
                preferred_element_type=jnp.float32)                  # (NB, HW)
    y = jnp.maximum(y + bn_ref[0], 0.0)                              # BN shift + ReLU
    sscale = jax.nn.sigmoid(y)                                       # (NB, HW)

    # forward(x) = x*cscale + x*sscale, fused as one broadcast add + one mul.
    scale = cscale[:, :, None] + sscale[:, None, :]                  # (NB, C, HW)
    o_ref[...] = (xf * scale).astype(o_ref.dtype)


# ------------------------------ glue helpers -------------------------------- #

def _build_conv1d_band(w3, c2, c):
    """(C, C2) banded matrix B so that (B @ a) == cat(conv1d_k3_pad1(a), zeros)
    as a column vector (the zero rows reproduce E2 = conv7(0) = 0)."""
    r = jnp.arange(c)[:, None]      # output channel index
    j = jnp.arange(c2)[None, :]     # input channel index
    t = j - r + 1                   # conv tap index
    return jnp.where((t >= 0) & (t <= 2) & (r < c2),
                     w3[jnp.clip(t, 0, 2)], 0.0).astype(jnp.float32)


def _build_spatial_band_T(w77, h, w):
    """(HW, HW) matrix T with T[q, p] = w77[qh-ph+3, qw-pw+3] so that the
    row-vector product f1 @ T equals conv2d_7x7_pad3(f1) on the flattened map."""
    hw = h * w
    pos = jnp.arange(hw)
    rh, rw = pos // w, pos % w
    dh = rh[:, None] - rh[None, :] + 3
    dw = rw[:, None] - rw[None, :] + 3
    valid = (dh >= 0) & (dh < 7) & (dw >= 0) & (dw < 7)
    taps = w77[jnp.clip(dh, 0, 6), jnp.clip(dw, 0, 6)]
    return jnp.where(valid, taps, 0.0).astype(jnp.float32)


def context_block_forward(x_nchw, conv_1x1_w, conv1d_w, convs_1x1_w, spatial_w,
                          bn_gamma, bn_beta, bn_mean, bn_var, bn_eps=1e-5,
                          nb=None):
    N, C, H, W = x_nchw.shape
    HW = H * W
    C2 = conv_1x1_w.shape[0]
    assert conv_1x1_w.shape[1] == C and 2 * C2 == C, "kernel models the 2*C2==C branch"

    # Batch block: fill the 8-sublane / MXU granularity.  On v7x with a small N,
    # pass nb=N//2 so the grid keeps >=2 "parallel" steps for both TensorCores.
    if nb is None:
        nb = min(N, 8)
    n_blocks = -(-N // nb)
    n_pad = n_blocks * nb

    # (N, C, HW): free reshape of the NCHW input, native dtype kept (bf16 callers
    # get bf16-in / bf16-out, halving x/out HBM traffic; demo uses f32).
    x = x_nchw.reshape(N, C, HW)
    if n_pad != N:
        x = jnp.concatenate([x, jnp.zeros((n_pad - N, C, HW), x.dtype)], axis=0)

    # ChannelGate linear map: conv1d(k=3, pad=1) over channels composed with the
    # 1x1 conv (C -> C2), stored transposed so e = xm @ cmatT with M = NB.
    w1 = conv_1x1_w[:, :, 0, 0].astype(jnp.float32)                       # (C2, C)
    band = _build_conv1d_band(conv1d_w[0, 0].astype(jnp.float32), C2, C)  # (C, C2)
    chan_mat_T = jnp.dot(band, w1,
                         precision=lax.Precision.HIGHEST).T.astype(jnp.bfloat16)

    # SpatialGate: block-diagonal 1x1 weights (one M=NB matmul over the whole
    # block) + banded 7x7 matrix with BN scale folded, both bf16.
    ws_row = convs_1x1_w[:, :, 0, 0].astype(jnp.float32)                  # (1, C)
    bdiag = jnp.kron(jnp.eye(nb, dtype=jnp.float32),
                     ws_row).astype(jnp.bfloat16)                         # (NB, NB*C)
    bn_scale = bn_gamma[0] / jnp.sqrt(bn_var[0] + bn_eps)
    bn_shift = (bn_beta[0] - bn_mean[0] * bn_scale).reshape(1).astype(jnp.float32)
    # TODO(synk): the dense (HW, HW) band is O(HW^2); for feature maps past
    # ~32x32 switch to 49 pltpu.roll shift-adds (f32, XLU) or an HW-tiled banded
    # matmul so VMEM stays bounded (v7x has only 64 MiB physical VMEM).
    smat = (_build_spatial_band_T(spatial_w[0, 0].astype(jnp.float32), H, W)
            * bn_scale).astype(jnp.bfloat16)                              # (HW, HW)

    out = pl.pallas_call(
        context_block_kernel,
        out_shape=jax.ShapeDtypeStruct((n_pad, C, HW), x.dtype),
        grid=(n_blocks,),
        in_specs=[
            pl.BlockSpec((nb, C, HW), lambda i: (i, 0, 0)),               # x block
            pl.BlockSpec((C, C), lambda i: (0, 0)),                       # chan_mat_T
            pl.BlockSpec((nb, nb * C), lambda i: (0, 0)),                 # bdiag
            pl.BlockSpec((HW, HW), lambda i: (0, 0)),                     # smat (bf16)
            pl.BlockSpec(memory_space=pltpu.MemorySpace.SMEM),            # bn_shift
        ],
        out_specs=pl.BlockSpec((nb, C, HW), lambda i: (i, 0, 0)),
        compiler_params=pltpu.CompilerParams(
            dimension_semantics=("parallel",)),
    )(x, chan_mat_T, bdiag, smat, bn_shift)

    # Drop batch padding; free reshape back to NCHW.
    return out[:N].reshape(N, C, H, W)


# ---------------------------- pure-JAX reference ----------------------------- #

def context_block_reference(x, conv_1x1_w, conv1d_w, convs_1x1_w, spatial_w,
                            bn_gamma, bn_beta, bn_mean, bn_var, eps=1e-5):
    hp = lax.Precision.HIGHEST
    dn = ("NCHW", "OIHW", "NCHW")
    # ChannelGate
    b1 = lax.conv_general_dilated(x, conv_1x1_w, (1, 1), "VALID",
                                  dimension_numbers=dn, precision=hp)
    d1, d2 = b1, jnp.zeros_like(b1)
    a1 = jnp.mean(d1, axis=(2, 3))
    a2 = jnp.mean(d2, axis=(2, 3))
    w3 = conv1d_w[0, 0]

    def conv1d(a):
        ap = jnp.pad(a, ((0, 0), (1, 1)))
        return w3[0] * ap[:, :-2] + w3[1] * ap[:, 1:-1] + w3[2] * ap[:, 2:]

    scale_c = jax.nn.sigmoid(jnp.concatenate([conv1d(a1), conv1d(a2)], axis=1))
    cg = x * scale_c[:, :, None, None]
    # SpatialGate
    f1 = lax.conv_general_dilated(x, convs_1x1_w, (1, 1), "VALID",
                                  dimension_numbers=dn, precision=hp)
    xc = jnp.concatenate([f1, jnp.zeros_like(f1)], axis=1)
    y = lax.conv_general_dilated(xc, spatial_w, (1, 1), ((3, 3), (3, 3)),
                                 dimension_numbers=dn, precision=hp)
    y = (y - bn_mean[0]) * bn_gamma[0] / jnp.sqrt(bn_var[0] + eps) + bn_beta[0]
    y = jax.nn.relu(y)
    sg = x * jax.nn.sigmoid(y)
    return cg + sg


# ----------------------------------- main ------------------------------------ #

if __name__ == "__main__":
    key = jax.random.PRNGKey(0)
    k0, k1, k2, k3, k4 = jax.random.split(key, 5)

    N, C, H, W = 2, 128, 16, 16            # exercises the C==128 branch
    x = jax.random.normal(k0, (N, C, H, W), jnp.float32)

    # Deterministic synthetic parameters (shapes from the module's __init__).
    conv2_w = 0.05 * jax.random.normal(k1, (64, 128, 1, 1), jnp.float32)   # conv2
    conv7_w = 0.30 * jax.random.normal(k2, (1, 1, 3), jnp.float32)         # conv7
    convs2_w = 0.05 * jax.random.normal(k3, (1, 128, 1, 1), jnp.float32)   # convs2
    spatial_w = 0.10 * jax.random.normal(k4, (1, 2, 7, 7), jnp.float32)    # spatial conv
    bn_gamma = jnp.ones((1,), jnp.float32)
    bn_beta = jnp.zeros((1,), jnp.float32)
    bn_mean = jnp.zeros((1,), jnp.float32)   # eval-mode running stats
    bn_var = jnp.ones((1,), jnp.float32)
    # TODO(synk): training-mode BatchNorm batch statistics are not modeled.

    out = context_block_forward(x, conv2_w, conv7_w, convs2_w, spatial_w,
                                bn_gamma, bn_beta, bn_mean, bn_var)
    out = jax.block_until_ready(out)

    ref = context_block_reference(x, conv2_w, conv7_w, convs2_w, spatial_w,
                                  bn_gamma, bn_beta, bn_mean, bn_var)
    np.testing.assert_allclose(np.asarray(out), np.asarray(ref),
                               rtol=1e-2, atol=1e-2)
    print("KERNEL_OK")
</pallas_src>

<mosaic_0001>
module attributes {stable_mosaic.version = 11 : i64} {
  func.func @context_block_kernel(%arg0: i32, %arg1: memref<2x128x256xf32, #tpu.memory_space<vmem>>, %arg2: memref<128x128xbf16, #tpu.memory_space<vmem>>, %arg3: memref<2x256xbf16, #tpu.memory_space<vmem>>, %arg4: memref<256x256xbf16, #tpu.memory_space<vmem>>, %arg5: memref<1xf32, #tpu.memory_space<smem>>, %arg6: memref<2x128x256xf32, #tpu.memory_space<vmem>>) attributes {dimension_semantics = [#tpu.dimension_semantics<parallel>], iteration_bounds = array<i64: 1>, scalar_prefetch = 0 : i64, scratch_operands = 0 : i64, tpu.core_type = #tpu.core_type<tc>, window_params = [{transform_indices = @transform_0, window_bounds = array<i64: 2, 128, 256>}, {pipeline_mode = #tpu.pipeline_mode<synchronous>, transform_indices = @transform_1, window_bounds = array<i64: 128, 128>}, {pipeline_mode = #tpu.pipeline_mode<synchronous>, transform_indices = @transform_2, window_bounds = array<i64: 2, 256>}, {pipeline_mode = #tpu.pipeline_mode<synchronous>, transform_indices = @transform_3, window_bounds = array<i64: 256, 256>}, {transform_indices = @transform_4, window_bounds = array<i64: 1>}, {transform_indices = @transform_5, window_bounds = array<i64: 2, 128, 256>}]} {
    %c0 = arith.constant 0 : index
    %c0_0 = arith.constant 0 : index
    %c0_1 = arith.constant 0 : index
    %0 = vector.load %arg1[%c0, %c0_0, %c0_1] : memref<2x128x256xf32, #tpu.memory_space<vmem>>, vector<2x128x256xf32>
    %cst = arith.constant dense<0.000000e+00> : vector<2x128xf32>
    %1 = vector.multi_reduction <add>, %0, %cst [2] : vector<2x128x256xf32> to vector<2x128xf32>
    %cst_2 = arith.constant 2.560000e+02 : f32
    %2 = vector.broadcast %cst_2 : f32 to vector<2x128xf32>
    %3 = arith.divf %1, %2 : vector<2x128xf32>
    %4 = arith.truncf %3 : vector<2x128xf32> to vector<2x128xbf16>
    %c0_3 = arith.constant 0 : index
    %c0_4 = arith.constant 0 : index
    %5 = vector.load %arg2[%c0_3, %c0_4] : memref<128x128xbf16, #tpu.memory_space<vmem>>, vector<128x128xbf16>
    %cst_5 = arith.constant dense<0.000000e+00> : vector<2x128xf32>
    %6 = tpu.matmul %4, %5, %cst_5 {dimension_numbers = #tpu.dot_dimension_numbers<[1], [0], [0], [1], [0, 0, 1, 1], [], []>} : vector<2x128xbf16>, vector<128x128xbf16>, vector<2x128xf32> -> vector<2x128xf32>
    %7 = arith.negf %6 : vector<2x128xf32>
    %8 = math.exp %7 : vector<2x128xf32>
    %cst_6 = arith.constant 1.000000e+00 : f32
    %9 = vector.broadcast %cst_6 : f32 to vector<2x128xf32>
    %10 = arith.addf %9, %8 : vector<2x128xf32>
    %11 = arith.divf %9, %10 : vector<2x128xf32>
    %12 = vector.shape_cast %0 : vector<2x128x256xf32> to vector<256x256xf32>
    %13 = arith.truncf %12 : vector<256x256xf32> to vector<256x256xbf16>
    %c0_7 = arith.constant 0 : index
    %c0_8 = arith.constant 0 : index
    %14 = vector.load %arg3[%c0_7, %c0_8] : memref<2x256xbf16, #tpu.memory_space<vmem>>, vector<2x256xbf16>
    %cst_9 = arith.constant dense<0.000000e+00> : vector<2x256xf32>
    %15 = tpu.matmul %14, %13, %cst_9 {dimension_numbers = #tpu.dot_dimension_numbers<[1], [0], [0], [1], [0, 0, 1, 1], [], []>} : vector<2x256xbf16>, vector<256x256xbf16>, vector<2x256xf32> -> vector<2x256xf32>
    %16 = arith.truncf %15 : vector<2x256xf32> to vector<2x256xbf16>
    %c0_10 = arith.constant 0 : index
    %c0_11 = arith.constant 0 : index
    %17 = vector.load %arg4[%c0_10, %c0_11] : memref<256x256xbf16, #tpu.memory_space<vmem>>, vector<256x256xbf16>
    %cst_12 = arith.constant dense<0.000000e+00> : vector<2x256xf32>
    %18 = tpu.matmul %16, %17, %cst_12 {dimension_numbers = #tpu.dot_dimension_numbers<[1], [0], [0], [1], [0, 0, 1, 1], [], []>} : vector<2x256xbf16>, vector<256x256xbf16>, vector<2x256xf32> -> vector<2x256xf32>
    %c0_13 = arith.constant 0 : index
    %19 = memref.load %arg5[%c0_13] : memref<1xf32, #tpu.memory_space<smem>>
    %20 = vector.broadcast %19 : f32 to vector<2x256xf32>
    %21 = arith.addf %18, %20 : vector<2x256xf32>
    %cst_14 = arith.constant 0.000000e+00 : f32
    %22 = vector.broadcast %cst_14 : f32 to vector<2x256xf32>
    %23 = arith.maximumf %21, %22 : vector<2x256xf32>
    %24 = arith.negf %23 : vector<2x256xf32>
    %25 = math.exp %24 : vector<2x256xf32>
    %cst_15 = arith.constant 1.000000e+00 : f32
    %26 = vector.broadcast %cst_15 : f32 to vector<2x256xf32>
    %27 = arith.addf %26, %25 : vector<2x256xf32>
    %28 = arith.divf %26, %27 : vector<2x256xf32>
    %29 = vector.shape_cast %11 : vector<2x128xf32> to vector<2x128x1xf32>
    %30 = vector.shape_cast %28 : vector<2x256xf32> to vector<2x1x256xf32>
    %31 = vector.broadcast %29 : vector<2x128x1xf32> to vector<2x128x256xf32>
    %32 = vector.broadcast %30 : vector<2x1x256xf32> to vector<2x128x256xf32>
    %33 = arith.addf %31, %32 : vector<2x128x256xf32>
    %34 = arith.mulf %0, %33 : vector<2x128x256xf32>
    %c0_16 = arith.constant 0 : index
    %c0_17 = arith.constant 0 : index
    %c0_18 = arith.constant 0 : index
    %35 = vector.load %arg6[%c0_16, %c0_17, %c0_18] : memref<2x128x256xf32, #tpu.memory_space<vmem>>, vector<2x128x256xf32>
    tpu.vector_store %arg6[%c0_16, %c0_17, %c0_18], %34 {strides = array<i32>} : memref<2x128x256xf32, #tpu.memory_space<vmem>>, vector<2x128x256xf32>,
    return
  }
  func.func @transform_0(%arg0: i32) -> (i32, i32, i32) {
    %c0_i32 = arith.constant 0 : i32
    %c0_i32_0 = arith.constant 0 : i32
    %c0_i32_1 = arith.constant 0 : i32
    return %arg0, %c0_i32, %c0_i32_0 : i32, i32, i32
  }
  func.func @transform_1(%arg0: i32) -> (i32, i32) {
    %c0_i32 = arith.constant 0 : i32
    %c0_i32_0 = arith.constant 0 : i32
    %c0_i32_1 = arith.constant 0 : i32
    return %c0_i32, %c0_i32_0 : i32, i32
  }
  func.func @transform_2(%arg0: i32) -> (i32, i32) {
    %c0_i32 = arith.constant 0 : i32
    %c0_i32_0 = arith.constant 0 : i32
    %c0_i32_1 = arith.constant 0 : i32
    return %c0_i32, %c0_i32_0 : i32, i32
  }
  func.func @transform_3(%arg0: i32) -> (i32, i32) {
    %c0_i32 = arith.constant 0 : i32
    %c0_i32_0 = arith.constant 0 : i32
    %c0_i32_1 = arith.constant 0 : i32
    return %c0_i32, %c0_i32_0 : i32, i32
  }
  func.func @transform_4(%arg0: i32) -> i32 {
    %c0_i32 = arith.constant 0 : i32
    %c0_i32_0 = arith.constant 0 : i32
    return %c0_i32 : i32
  }
  func.func @transform_5(%arg0: i32) -> (i32, i32, i32) {
    %c0_i32 = arith.constant 0 : i32
    %c0_i32_0 = arith.constant 0 : i32
    %c0_i32_1 = arith.constant 0 : i32
    return %arg0, %c0_i32, %c0_i32_0 : i32, i32, i32
  }
}

</mosaic_0001>

<bundles_post_ra>
// kernel: tpu_custom_call.1
= control target key start
LH: loop header
LB: loop body
LE: loop exit
PB: predicated region body
PF: predicated region fallthrough
CT: control target
= control target key end

     0   :  { %11 = vsyncpa [#allocation4], 0  ;;  %s2099_s0 = inlined_call_operand.hbm [shape: f32[2,128,256], index: 0, kind: input, shape index: {}]   ;;  %s2100_s1 = inlined_call_operand.hbm [shape: bf16[128,128], index: 1, kind: input, shape index: {}]   ;;  %s2101_s2 = inlined_call_operand.vmem [shape: bf16[2,256], index: 2, kind: input, shape index: {}]   ;;  %s2102_s3 = inlined_call_operand.hbm [shape: bf16[256,256], index: 3, kind: input, shape index: {}]   ;;  %s2103_s4 = inlined_call_operand.<no memory space> [shape: f32[1], index: 4, kind: input, shape index: {}]   ;;  %s2104_s5 = inlined_call_operand.hbm [shape: f32[2,128,256], index: 5, kind: output, shape index: {}]  }
   0x1   :  { %12 = vsyncpa [#allocation7], 0 }
   0x2   :  { %13 = vsyncpa [#allocation5], 0  ;;  %s1676_s18 = smov [#allocation6]   ;;  %s1582_s22 = scalar_lea.hbm %s2100_s1, 1024 }
   0x3   :  { %s31_s19 = sshll.u32 %s1676_s18, 4  ;;  %p1583_p0 = scmp.ne.s32.totalorder %s2100_s1, %s1582_s22  ;;  %s32_s19 = int_to_ptr.vmem [resolvable:$true] %s31_s19 }
   0x4   :  { %p1586_p1 = scmp.lt.u32.totalorder %s1582_s22, %s2100_s1 }
   0x6   :  { %p1588_p2 = pnand %p1586_p1, %p1583_p0 }
   0x8   :  { %1591 = shalt.err (!%p1588_p2)
}
   0x9   :  { %s1592_s27 = scalar_lea.vmem %s32_s19, 1024  ;;  %p1597_p4 = scmp.lt.s32.totalorder %s32_s19, %s32_s19 }
   0xa   :  { %p1593_p3 = scmp.ne.s32.totalorder %s32_s19, %s1592_s27  ;;  %p1598_p5 = scmp.lt.s32.totalorder %s1592_s27, %s1592_s27 }
   0xc   :  { %p1599_p6 = por %p1598_p5, %p1597_p4 }
   0xe   :  { %p1600_p7 = pnand %p1599_p6, %p1593_p3 }
  0x10   :  { %1603 = shalt.err (!%p1600_p7)
}
  0x11   :  { %s1677_s28 = smov 64   ;;  %s1678_s29 = smov 4  }
  0x12   :  { %37 = dma.hbm_to_vmem [thread:$0]  %s2100_s1, 1024, %s32_s19, [#allocation7], %s1677_s28, %s1677_s28, %s1678_s29  }
  0x13   :  { %s1679_s7 = smov [#allocation3]   ;;  %s1604_s11 = scalar_lea.hbm %s2099_s0, 8192 }
  0x14   :  { %s19_s8 = sshll.u32 %s1679_s7, 4  ;;  %p1605_p8 = scmp.ne.s32.totalorder %s2099_s0, %s1604_s11  ;;  %s20_s8 = int_to_ptr.vmem [resolvable:$true] %s19_s8 }
  0x15   :  { %p1608_p9 = scmp.lt.u32.totalorder %s1604_s11, %s2099_s0 }
  0x17   :  { %p1610_p10 = pnand %p1608_p9, %p1605_p8 }
  0x19   :  { %1613 = shalt.err (!%p1610_p10)
}
  0x1a   :  { %s1614_s16 = scalar_lea.vmem %s20_s8, 8192  ;;  %p1619_p12 = scmp.lt.s32.totalorder %s20_s8, %s20_s8 }
  0x1b   :  { %p1615_p11 = scmp.ne.s32.totalorder %s20_s8, %s1614_s16  ;;  %p1620_p13 = scmp.lt.s32.totalorder %s1614_s16, %s1614_s16 }
  0x1d   :  { %p1621_p0 = por %p1620_p13, %p1619_p12 }
  0x1f   :  { %p1622_p1 = pnand %p1621_p0, %p1615_p11 }
  0x21   :  { %1625 = shalt.err (!%p1622_p1)
}
  0x22   :  { %s1680_s1 = smov 256   ;;  %s1681_s17 = smov 16  }
  0x23   :  { %25 = dma.hbm_to_vmem [thread:$0]  %s2099_s0, 8192, %s20_s8, [#allocation4], %s1680_s1, %s1680_s1, %s1681_s17  }
  0x24   :  { %s1682_s20 = smov [#allocation8]   ;;  %s1626_s24 = scalar_lea.hbm %s2102_s3, 4096 }
  0x25   :  { %s45_s21 = sshll.u32 %s1682_s20, 4  ;;  %p1627_p2 = scmp.ne.s32.totalorder %s2102_s3, %s1626_s24  ;;  %s46_s21 = int_to_ptr.vmem [resolvable:$true] %s45_s21 }
  0x26   :  { %p1630_p3 = scmp.lt.u32.totalorder %s1626_s24, %s2102_s3 }
  0x28   :  { %p1632_p4 = pnand %p1630_p3, %p1627_p2 }
  0x2a   :  { %1635 = shalt.err (!%p1632_p4)
}
  0x2b   :  { %s1636_s29 = scalar_lea.vmem %s46_s21, 4096  ;;  %p1641_p6 = scmp.lt.s32.totalorder %s46_s21, %s46_s21 }
  0x2c   :  { %p1637_p5 = scmp.ne.s32.totalorder %s46_s21, %s1636_s29  ;;  %p1642_p7 = scmp.lt.s32.totalorder %s1636_s29, %s1636_s29 }
  0x2e   :  { %p1643_p8 = por %p1642_p7, %p1641_p6 }
  0x30   :  { %p1644_p9 = pnand %p1643_p8, %p1637_p5 }
  0x32   :  { %1647 = shalt.err (!%p1644_p9)
}
  0x33   :  { %s1683_s0 = smov 128   ;;  %s1684_s30 = smov 8  }
  0x34   :  { %51 = dma.hbm_to_vmem [thread:$0]  %s2102_s3, 4096, %s46_s21, [#allocation7], %s1683_s0, %s1683_s0, %s1684_s30  }
  0x35   :  { %1670 = dma.done.wait [#allocation4], 8192  }
  0x36   :  { %1671 = vsyncadd [#allocation4], 4294959104 }
  0x37   :  { %1672 = dma.done.wait [#allocation7], 5120  }
  0x38   :  { %1673 = vsyncadd [#allocation7], 4294962176  ;;  %v1758_v0 = vld [vmem:[#allocation3 + $0x100] sm:$0xff]  ;;  %v1760_v1 = vld [vmem:[#allocation3 + $0x108] sm:$0xff]  ;;  %v337_v37 = vlaneseq  ;;  %v1685_v38 = vmov 1966171168  }
  0x39   :  { %v64_v2 = vld [vmem:[#allocation3] sm:$0xff]  ;;  %v176_v3 = vadd.f32 %v1760_v1, %v1758_v0  ;;  %v65_v4 = vld [vmem:[#allocation3 + $0x8] sm:$0xff]  ;;  %v1764_v5 = vld [vmem:[#allocation3 + $0x110] sm:$0xff]  ;;  %v668_v39 = vunpack.c.l.s4 %v1685_v38  ;;  %vm1687_vm0 = vmmov 0   ;;  %vm348_vm1 = vcmask 130112  }
  0x3a   :  { %v1766_v6 = vld [vmem:[#allocation3 + $0x118] sm:$0xff]  ;;  %v128_v7 = vadd.f32 %v65_v4, %v64_v2  ;;  %v66_v8 = vld [vmem:[#allocation3 + $0x10] sm:$0xff]  ;;  %v69_v12 = vld [vmem:[#allocation3 + $0x28] sm:$0xff]  ;;  %v1795_v51 = vshrl.u32 %v337_v37, 7  ;;  %vm355_vm2 = vcmask 195712   ;;  %vm362_vm3 = vcmask 261312  }
  0x3b   :  { %v67_v9 = vld [vmem:[#allocation3 + $0x18] sm:$0xff]  ;;  %177 = vadd.xlane.f32.xlu1 %v176_v3  ;;  %v179_v10 = vadd.f32 %v1766_v6, %v1764_v5  ;;  %v625_v14 = vpack.c.bf16 %v66_v8, %v64_v2  ;;  %v70_v16 = vld [vmem:[#allocation3 + $0x30] sm:$0xff]  ;;  %v68_v18 = vld [vmem:[#allocation3 + $0x20] sm:$0xff]  ;;  %v669_v52 = vunpack.c.0.s8 %v668_v39  ;;  %v642_v39 = vpack.c.bf16 %v1766_v6, %v1760_v1 }
  0x3c   :  { %v71_v11 = vld [vmem:[#allocation3 + $0x38] sm:$0xff]  ;;  %v626_v13 = vpack.c.bf16 %v67_v9, %v65_v4  ;;  %129 = vadd.xlane.f32.xlu0 %v128_v7  ;;  %v131_v15 = vadd.f32 %v67_v9, %v66_v8  ;;  %v73_v20 = vld [vmem:[#allocation3 + $0x48] sm:$0xff]  ;;  %v627_v21 = vpack.c.bf16 %v70_v16, %v68_v18  ;;  %v134_v24 = vadd.f32 %v69_v12, %v68_v18  ;;  %v1770_v25 = vld [vmem:[#allocation3 + $0x130] sm:$0xff] }
  0x3d   :  { %v628_v17 = vpack.c.bf16 %v71_v11, %v69_v12  ;;  %v75_v19 = vld [vmem:[#allocation3 + $0x58] sm:$0xff]  ;;  %v137_v22 = vadd.f32 %v71_v11, %v70_v16  ;;  %v1774_v27 = vld [vmem:[#allocation3 + $0x120] sm:$0xff]  ;;  %v1776_v28 = vld [vmem:[#allocation3 + $0x128] sm:$0xff]  ;;  %v1810_v2 = vsub.s32 %v669_v52, %v1795_v51  ;;  %vm369_vm4 = vcmask 326912  }
  0x3e   :  { %683 = vmatprep.subr.bf16.mxu1 %v626_v13  ;;  %v630_v23 = vpack.c.bf16 %v75_v19, %v73_v20  ;;  %v1772_v26 = vld [vmem:[#allocation3 + $0x138] sm:$0xff]  ;;  %v74_v29 = vld [vmem:[#allocation3 + $0x50] sm:$0xff]  ;;  %v72_v30 = vld [vmem:[#allocation3 + $0x40] sm:$0xff]  ;;  %v182_v36 = vadd.f32 %v1776_v28, %v1774_v27  ;;  %vm376_vm5 = vcmask 392512   ;;  %vm383_vm6 = vcmask 458112  }
  0x3f   :  { %684 = vmatpush1.bf16.msra.mxu1 %v625_v14  ;;  %180 = vadd.xlane.f32.xlu1 %v179_v10  ;;  %v79_v31 = vld [vmem:[#allocation3 + $0x78] sm:$0xff]  ;;  %v77_v32 = vld [vmem:[#allocation3 + $0x68] sm:$0xff]  ;;  %v629_v33 = vpack.c.bf16 %v74_v29, %v72_v30  ;;  %v185_v34 = vadd.f32 %v1772_v26, %v1770_v25  ;;  %v78_v40 = vld [vmem:[#allocation3 + $0x70] sm:$0xff]  ;;  %v143_v45 = vadd.f32 %v75_v19, %v74_v29  ;;  %vm390_vm7 = vcmask 523712  }
  0x40   :  { %685 = vmatprep.subr.bf16.mxu1 %v628_v17  ;;  %132 = vadd.xlane.f32.xlu0 %v131_v15  ;;  %v632_v35 = vpack.c.bf16 %v79_v31, %v77_v32  ;;  %v76_v41 = vld [vmem:[#allocation3 + $0x60] sm:$0xff]  ;;  %v1782_v42 = vld [vmem:[#allocation3 + $0x98] sm:$0xff]  ;;  %v1784_v43 = vld [vmem:[#allocation3 + $0x88] sm:$0xff]  ;;  %v140_v47 = vadd.f32 %v73_v20, %v72_v30  ;;  %v149_v12 = vadd.f32 %v79_v31, %v78_v40  ;;  %vm397_vm8 = vcmask 589312  }
  0x41   :  { %v631_v44 = vpack.c.bf16 %v78_v40, %v76_v41  ;;  %v634_v46 = vpack.c.bf16 %v1782_v42, %v1784_v43  ;;  %v1788_v48 = vld [vmem:[#allocation3 + $0x150] sm:$0xff]  ;;  %v1790_v49 = vld [vmem:[#allocation3 + $0x158] sm:$0xff]  ;;  %v1792_v50 = vld [vmem:[#allocation3 + $0x140] sm:$0xff]  ;;  %v146_v18 = vadd.f32 %v77_v32, %v76_v41  ;;  %v641_v41 = vpack.c.bf16 %v1764_v5, %v1758_v0 }
  0x42   :  { %v1797_v53 = vld [vmem:[#allocation3 + $0x148] sm:$0xff]  ;;  %v82_v54 = vld [vmem:[#allocation3 + $0x90] sm:$0xff]  ;;  %v80_v55 = vld [vmem:[#allocation3 + $0x80] sm:$0xff]  ;;  %v191_v59 = vadd.f32 %v1790_v49, %v1788_v48  ;;  %vm404_vm9 = vcmask 654912   ;;  %vm411_vm10 = vcmask 720512   ;;  %vm418_vm11 = vcmask 786112  }
  0x43   :  { %686 = vmatpush1.bf16.msra.mxu1 %v627_v21  ;;  %138 = vadd.xlane.f32.xlu1 %v137_v22  ;;  %v1799_v56 = vld [vmem:[#allocation3 + $0xb8] sm:$0xff]  ;;  %v1801_v57 = vld [vmem:[#allocation3 + $0xa8] sm:$0xff]  ;;  %v633_v58 = vpack.c.bf16 %v82_v54, %v80_v55  ;;  %v188_v61 = vadd.f32 %v1797_v53, %v1792_v50  ;;  %v86_v62 = vld [vmem:[#allocation3 + $0xb0] sm:$0xff]  ;;  %v152_v40 = vadd.f32 %v1784_v43, %v80_v55  ;;  %vm425_vm12 = vcmask 851712  }
  0x44   :  { %687 = vmatprep.subr.bf16.mxu1 %v630_v23  ;;  %135 = vadd.xlane.f32.xlu0 %v134_v24  ;;  %v636_v60 = vpack.c.bf16 %v1799_v56, %v1801_v57  ;;  %v84_v63 = vld [vmem:[#allocation3 + $0xa0] sm:$0xff]  ;;  %v1812_v3 = vld [vmem:[#allocation3 + $0xd8] sm:$0xff]  ;;  %v1814_v4 = vld [vmem:[#allocation3 + $0xc8] sm:$0xff]  ;;  %v161_v1 = vadd.f32 %v1799_v56, %v86_v62  ;;  %v646_v6 = vpack.c.bf16 %v1790_v49, %v1797_v53  ;;  %vm432_vm13 = vcmask 917312  }
  0x45   :  { %v1819_v7 = vld.sshfl [vmem:[%s2101_s2] sm:$0x11 pattern:$0x75316420]  ;;  %v1821_v8 = vld [vmem:[#allocation3 + $0x170] sm:$0xff]  ;;  %v1823_v9 = vld [vmem:[#allocation3 + $0x178] sm:$0xff]  ;;  %v635_v10 = vpack.c.bf16 %v86_v62, %v84_v63  ;;  %v638_v17 = vpack.c.bf16 %v1812_v3, %v1814_v4  ;;  %v158_v0 = vadd.f32 %v1801_v57, %v84_v63 }
  0x46   :  { %v666_v11 = vcombine.high %v1819_v7, %v1819_v7  ;;  %v1827_v13 = vld [vmem:[#allocation3 + $0x160] sm:$0xff]  ;;  %v1829_v14 = vld [vmem:[#allocation3 + $0x168] sm:$0xff]  ;;  %v1831_v15 = vld [vmem:[#allocation3 + $0xd0] sm:$0xff]  ;;  %v197_v23 = vadd.f32 %v1823_v9, %v1821_v8  ;;  %vm439_vm14 = vcmask 982912   ;;  %vm446_vm15 = vcmask 1048512  }
  0x47   :  { %688 = vmatpush1.bf16.msra.mxu1 %v629_v33  ;;  %186 = vadd.xlane.f32.xlu1 %v185_v34  ;;  %v1833_v16 = vld [vmem:[#allocation3 + $0xc0] sm:$0xff]  ;;  %v1837_v19 = vld [vmem:[#allocation3 + $0xf8] sm:$0xff]  ;;  %v1839_v20 = vld [vmem:[#allocation3 + $0xe8] sm:$0xff]  ;;  %v194_v31 = vadd.f32 %v1829_v14, %v1827_v13  ;;  %v647_v49 = vpack.c.bf16 %v1821_v8, %v1827_v13  ;;  %v167_v53 = vadd.f32 %v1812_v3, %v1831_v15 }
  0x48   :  { %689 = vmatprep.subr.bf16.mxu1 %v632_v35  ;;  %183 = vadd.xlane.f32.xlu0 %v182_v36  ;;  %v680_v21 = vrot.slane %v666_v11, %v1810_v2  ;;  %v637_v22 = vpack.c.bf16 %v1831_v15, %v1833_v16  ;;  %v1846_v24 = vld [vmem:[#allocation3 + $0xf0] sm:$0xff]  ;;  %v1848_v29 = vld [vmem:[#allocation3 + $0xe0] sm:$0xff]  ;;  %v640_v30 = vpack.c.bf16 %v1837_v19, %v1839_v20  ;;  %v115_v33 = vld [vmem:[#allocation3 + $0x198] sm:$0xff] }
  0x49   :  { %v114_v32 = vld [vmem:[#allocation3 + $0x190] sm:$0xff]  ;;  %v639_v34 = vpack.c.bf16 %v1846_v24, %v1848_v29  ;;  %v155_v35 = vadd.f32 %v1782_v42, %v82_v54  ;;  %v112_v36 = vld [vmem:[#allocation3 + $0x180] sm:$0xff]  ;;  %v113_v38 = vld [vmem:[#allocation3 + $0x188] sm:$0xff]  ;;  %v173_v63 = vadd.f32 %v1837_v19, %v1846_v24 }
  0x4a   :  { %715 = vmatprep.mubr.bf16.mxu1 %v680_v21  ;;  %v200_v42 = vadd.f32 %v113_v38, %v112_v36  ;;  %v118_v5 = vld [vmem:[#allocation3 + $0x1b0] sm:$0xff]  ;;  %v119_v43 = vld [vmem:[#allocation3 + $0x1b8] sm:$0xff]  ;;  %v650_v54 = vpack.c.bf16 %v115_v33, %v113_v38  ;;  %v120_v56 = vld [vmem:[#allocation3 + $0x1c0] sm:$0xff] }
  0x4b   :  { %690 = vmatpush1.bf16.msra.mxu1 %v631_v44  ;;  %144 = vadd.xlane.f32.xlu1 %v143_v45  ;;  %v203_v44 = vadd.f32 %v115_v33, %v114_v32  ;;  %v644_v45 = vpack.c.bf16 %v1772_v26, %v1776_v28  ;;  %v117_v26 = vld [vmem:[#allocation3 + $0x1a8] sm:$0xff]  ;;  %v645_v28 = vpack.c.bf16 %v1788_v48, %v1792_v50  ;;  %v122_v50 = vld [vmem:[#allocation3 + $0x1d0] sm:$0xff]  ;;  %v123_v55 = vld [vmem:[#allocation3 + $0x1d8] sm:$0xff] }
  0x4c   :  { %691 = vmatprep.subr.bf16.mxu1 %v634_v46  ;;  %141 = vadd.xlane.f32.xlu0 %v140_v47  ;;  %v643_v46 = vpack.c.bf16 %v1770_v25, %v1774_v27  ;;  %v116_v47 = vld [vmem:[#allocation3 + $0x1a0] sm:$0xff]  ;;  %v209_v25 = vadd.f32 %v119_v43, %v118_v5  ;;  %v648_v27 = vpack.c.bf16 %v1823_v9, %v1829_v14  ;;  %v121_v57 = vld [vmem:[#allocation3 + $0x1c8] sm:$0xff]  ;;  %v126_v8 = vld [vmem:[#allocation3 + $0x1f0] sm:$0xff] }
  0x4d   :  { %v206_v52 = vadd.f32 %v117_v26, %v116_v47  ;;  %v164_v48 = vadd.f32 %v1814_v4, %v1833_v16  ;;  %v651_v62 = vpack.c.bf16 %v118_v5, %v116_v47  ;;  %v654_v3 = vpack.c.bf16 %v123_v55, %v121_v57  ;;  %v127_v9 = vld [vmem:[#allocation3 + $0x1f8] sm:$0xff]  ;;  %v125_v11 = vld [vmem:[#allocation3 + $0x1e8] sm:$0xff]  ;;  %v1450_v13 = vld [vmem:[#allocation6] sm:$0xff]  }
  0x4e   :  { %v170_v4 = vadd.f32 %v1839_v20, %v1848_v29  ;;  %v221_v14 = vadd.f32 %v127_v9, %v126_v8  ;;  %v656_v15 = vpack.c.bf16 %v127_v9, %v125_v11  ;;  %v1451_v19 = vld [vmem:[#allocation6 + $0x8] sm:$0xff]   ;;  %v673_v20 = vrot.slane %v1819_v7, %v1810_v2  ;;  %v1452_v21 = vld [vmem:[#allocation6 + $0x10] sm:$0xff]  }
  0x4f   :  { %692 = vmatpush1.bf16.msra.mxu1 %v633_v58  ;;  %192 = vadd.xlane.f32.xlu1 %v191_v59  ;;  %v649_v58 = vpack.c.bf16 %v114_v32, %v112_v36  ;;  %v215_v59 = vadd.f32 %v123_v55, %v122_v50  ;;  %v1455_v24 = vld [vmem:[#allocation6 + $0x28] sm:$0xff]   ;;  %v1456_v29 = vld [vmem:[#allocation6 + $0x30] sm:$0xff]  }
  0x50   :  { %693 = vmatprep.subr.bf16.mxu1 %v636_v60  ;;  %189 = vadd.xlane.f32.xlu0 %v188_v61  ;;  %v652_v60 = vpack.c.bf16 %v119_v43, %v117_v26  ;;  %v212_v61 = vadd.f32 %v121_v57, %v120_v56  ;;  %v1460_v7 = vld [vmem:[#allocation8 + $0x4] ss:$8 sps:$4 sm:$0xff]  }
  0x53   :  { %694 = vmatpush1.bf16.msra.mxu1 %v635_v10  ;;  %150 = vadd.xlane.f32.xlu1 %v149_v12  ;;  %v124_v10 = vld [vmem:[#allocation3 + $0x1e0] sm:$0xff]  ;;  %v653_v12 = vpack.c.bf16 %v122_v50, %v120_v56 }
  0x54   :  { %695 = vmatprep.subr.bf16.mxu1 %v638_v17  ;;  %147 = vadd.xlane.f32.xlu0 %v146_v18  ;;  %v218_v16 = vadd.f32 %v125_v11, %v124_v10  ;;  %v1686_v17 = vmov 0.0   ;;  %v655_v18 = vpack.c.bf16 %v126_v8, %v124_v10 }
  0x55   :  { %1417 = vmatprep.subr.bf16.mxu0 %v1686_v17  ;;  %1433 = vmatprep.mubr.msk.bf16.mxu0 %vm1687_vm0, %v1686_v17  ;;  %vm527_vm0 = vcmask 1041409  }
  0x56   :  { %1418 = vmatpush3.bf16.msra.mxu0 %v1450_v13 }
  0x57   :  { %696 = vmatpush1.bf16.msra.mxu1 %v637_v22  ;;  %198 = vadd.xlane.f32.xlu1 %v197_v23  ;;  %v1453_v22 = vld [vmem:[#allocation6 + $0x18] sm:$0xff]   ;;  %v1454_v23 = vld [vmem:[#allocation6 + $0x20] sm:$0xff]  }
  0x58   :  { %697 = vmatprep.subr.bf16.mxu1 %v640_v30  ;;  %195 = vadd.xlane.f32.xlu0 %v194_v31  ;;  %v1457_v30 = vld [vmem:[#allocation6 + $0x38] sm:$0xff]  }
  0x59   :  { %1419 = vmatprep.subr.bf16.mxu0 %v1686_v17 }
  0x5a   :  { %1420 = vmatpush3.bf16.msra.mxu0 %v1451_v19 }
  0x5b   :  { %698 = vmatpush1.bf16.msra.mxu1 %v639_v34  ;;  %156 = vadd.xlane.f32.xlu1 %v155_v35 }
  0x5c   :  { %699 = vmatprep.subr.bf16.mxu1 %v642_v39  ;;  %153 = vadd.xlane.f32.xlu0 %v152_v40 }
  0x5d   :  { %1421 = vmatprep.subr.bf16.mxu0 %v1686_v17 }
  0x5e   :  { %1422 = vmatpush3.bf16.msra.mxu0 %v1452_v21 }
  0x5f   :  { %700 = vmatpush1.bf16.msra.mxu1 %v641_v41  ;;  %204 = vadd.xlane.f32.xlu1 %v203_v44 }
  0x60   :  { %701 = vmatprep.subr.bf16.mxu1 %v644_v45  ;;  %201 = vadd.xlane.f32.xlu0 %v200_v42  ;;  %v1887_v45 = vand.u32 127, %v337_v37 }
  0x61   :  { %1423 = vmatprep.subr.bf16.mxu0 %v1686_v17 }
  0x62   :  { %1424 = vmatpush3.bf16.msra.mxu0 %v1453_v22  ;;  %v350_v5 = vadd.s32 4294967280, %v1887_v45  ;;  %v357_v43 = vadd.s32 4294967272, %v1887_v45  ;;  %v378_v50 = vadd.s32 4294967248, %v1887_v45  ;;  %v399_v10 = vadd.s32 4294967224, %v1887_v45 }
  0x63   :  { %702 = vmatpush1.bf16.msra.mxu1 %v643_v46  ;;  %162 = vadd.xlane.f32.xlu1 %v161_v1 }
  0x64   :  { %703 = vmatprep.subr.bf16.mxu1 %v646_v6  ;;  %159 = vadd.xlane.f32.xlu0 %v158_v0  ;;  %v343_v6 = vadd.s32 4294967288, %v1887_v45 }
  0x65   :  { %1425 = vmatprep.subr.bf16.mxu0 %v1686_v17 }
  0x66   :  { %1426 = vmatpush3.bf16.msra.mxu0 %v1454_v23  ;;  %v346_v56 = vsub.s32 %v343_v6, %v1795_v51 }
  0x67   :  { %704 = vmatpush1.bf16.msra.mxu1 %v645_v28  ;;  %210 = vadd.xlane.f32.xlu1 %v209_v25 }
  0x68   :  { %705 = vmatprep.subr.bf16.mxu1 %v648_v27  ;;  %207 = vadd.xlane.f32.xlu0 %v206_v52  ;;  %v364_v27 = vadd.s32 4294967264, %v1887_v45 }
  0x69   :  { %1427 = vmatprep.subr.bf16.mxu0 %v1686_v17 }
  0x6a   :  { %1428 = vmatpush3.bf16.msra.mxu0 %v1455_v24  ;;  %v406_v24 = vadd.s32 4294967216, %v1887_v45 }
  0x6b   :  { %706 = vmatpush1.bf16.msra.mxu1 %v647_v49  ;;  %168 = vadd.xlane.f32.xlu1 %v167_v53  ;;  %v341_v53 = vsub.s32 %v1887_v45, %v1795_v51 }
  0x6c   :  { %707 = vmatprep.subr.bf16.mxu1 %v650_v54  ;;  %165 = vadd.xlane.f32.xlu0 %v164_v48  ;;  %v371_v48 = vadd.s32 4294967256, %v1887_v45 }
  0x6d   :  { %1429 = vmatprep.subr.bf16.mxu0 %v1686_v17 }
  0x6e   :  { %1430 = vmatpush3.bf16.msra.mxu0 %v1456_v29  ;;  %v1909_v13 = vsub.s32 %v371_v48, %v1795_v51 }
  0x6f   :  { %708 = vmatpush1.bf16.msra.mxu1 %v649_v58  ;;  %216 = vadd.xlane.f32.xlu1 %v215_v59  ;;  %v353_v58 = vsub.s32 %v350_v5, %v1795_v51  ;;  %v1900_v59 = vsub.s32 %v357_v43, %v1795_v51 }
  0x70   :  { %709 = vmatprep.subr.bf16.mxu1 %v652_v60  ;;  %213 = vadd.xlane.f32.xlu0 %v212_v61 }
  0x71   :  { %1431 = vmatprep.subr.bf16.mxu0 %v1686_v17 }
  0x72   :  { %1432 = vmatpush3.bf16.msra.mxu0 %v1457_v30 }
  0x73   :  { %710 = vmatpush1.bf16.msra.mxu1 %v651_v62  ;;  %174 = vadd.xlane.f32.xlu1 %v173_v63  ;;  %v1903_v62 = vsub.s32 %v364_v27, %v1795_v51  ;;  %v385_v63 = vadd.s32 4294967240, %v1887_v45 }
  0x74   :  { %711 = vmatprep.subr.bf16.mxu1 %v654_v3  ;;  %171 = vadd.xlane.f32.xlu0 %v170_v4  ;;  %v392_v3 = vadd.s32 4294967232, %v1887_v45 }
  0x75   :  { %920 = vmatprep.subr.bf16.mxu0 %v1460_v7  ;;  %v1915_v22 = vsub.s32 %v385_v63, %v1795_v51  ;;  %v1922_v7 = vsub.s32 %v399_v10, %v1795_v51 }
  0x76   :  { %v1918_v23 = vsub.s32 %v392_v3, %v1795_v51 }
  0x77   :  { %712 = vmatpush1.bf16.msra.mxu1 %v653_v12  ;;  %222 = vadd.xlane.f32.xlu1 %v221_v14  ;;  %v1912_v14 = vsub.s32 %v378_v50, %v1795_v51 }
  0x78   :  { %713 = vmatprep.subr.bf16.mxu1 %v656_v15  ;;  %219 = vadd.xlane.f32.xlu0 %v218_v16 }
  0x7b   :  { %714 = vmatpush1.bf16.msra.mxu1 %v655_v18 }
  0x7e   :  { %716 = vmatmul.mubr.bf16.vlgmr.msra.gmra.mrb[0].mxu1 %v673_v20 }
  0xc8   :  { %v178_v31 = vpop.xlane.xlu1 %177 }
  0xc9   :  { %v130_v32 = vpop.xlane.xlu0 %129  ;;  %v241_v26 = vmul.f32 0.00390625, %v178_v31  ;;  %v413_v31 = vadd.s32 4294967208, %v1887_v45 }
  0xca   :  { %v225_v52 = vmul.f32 0.00390625, %v130_v32 }
  0xcc   :  { %v181_v33 = vpop.xlane.xlu1 %180 }
  0xcd   :  { %v133_v34 = vpop.xlane.xlu0 %132  ;;  %v242_v46 = vmul.f32 0.00390625, %v181_v33 }
  0xce   :  { %v226_v0 = vmul.f32 0.00390625, %v133_v34 }
  0xcf   :  { %v265_v54 = vpack.c.bf16 %v242_v46, %v241_v26 }
  0xd0   :  { %v139_v35 = vpop.xlane.xlu1 %138  ;;  %v257_v57 = vpack.c.bf16 %v226_v0, %v225_v52  ;;  %v1926_v0 = vsub.s32 %v406_v24, %v1795_v51  ;;  %v420_v52 = vadd.s32 4294967200, %v1887_v45 }
  0xd1   :  { %v136_v36 = vpop.xlane.xlu0 %135  ;;  %v228_v28 = vmul.f32 0.00390625, %v139_v35  ;;  %v321_v11 = vunpack.c.l.b16 %v265_v54  ;;  %v322_v12 = vunpack.c.h.b16 %v265_v54 }
  0xd2   :  { %v227_v25 = vmul.f32 0.00390625, %v136_v36  ;;  %v305_v16 = vunpack.c.l.b16 %v257_v57  ;;  %v306_v17 = vunpack.c.h.b16 %v257_v57 }
  0xd3   :  { %v451_v32 = vrot.slane %v321_v11, %v341_v53  ;;  %v455_v33 = vrot.slane %v322_v12, %v346_v56 }
  0xd4   :  { %v187_v38 = vpop.xlane.xlu1 %186  ;;  %v258_v61 = vpack.c.bf16 %v228_v28, %v227_v25  ;;  %v1929_v28 = vsub.s32 %v413_v31, %v1795_v51 }
  0xd5   :  { %v184_v39 = vpop.xlane.xlu0 %183  ;;  %v244_v49 = vmul.f32 0.00390625, %v187_v38  ;;  %v342_v38 = vrot.slane %v305_v16, %v341_v53  ;;  %v1941_v16 = vsub.s32 %v420_v52, %v1795_v51 }
  0xd6   :  { %v243_v37 = vmul.f32 0.00390625, %v184_v39  ;;  %v307_v21 = vunpack.c.l.b16 %v258_v61  ;;  %v347_v39 = vrot.slane %v306_v17, %v346_v56  ;;  %v427_v17 = vadd.s32 4294967192, %v1887_v45 }
  0xd8   :  { %v145_v40 = vpop.xlane.xlu1 %144  ;;  %v266_v4 = vpack.c.bf16 %v244_v49, %v243_v37  ;;  %v456_v49 = vsel %vm348_vm1, %v455_v33, %v451_v32  ;;  %v349_v37 = vsel %vm348_vm1, %v347_v39, %v342_v38 }
  0xd9   :  { %v142_v41 = vpop.xlane.xlu0 %141  ;;  %v230_v8 = vmul.f32 0.00390625, %v145_v40  ;;  %v308_v40 = vunpack.c.h.b16 %v258_v61 }
  0xda   :  { %v229_v9 = vmul.f32 0.00390625, %v142_v41  ;;  %v323_v29 = vunpack.c.l.b16 %v266_v4  ;;  %v324_v5 = vunpack.c.h.b16 %v266_v4 }
  0xdb   :  { %v361_v53 = vrot.slane %v308_v40, %v1900_v59 }
  0xdc   :  { %v193_v44 = vpop.xlane.xlu1 %192  ;;  %v259_v30 = vpack.c.bf16 %v230_v8, %v229_v9  ;;  %v460_v43 = vrot.slane %v323_v29, %v353_v58 }
  0xdd   :  { %v190_v42 = vpop.xlane.xlu0 %189  ;;  %v246_v18 = vmul.f32 0.00390625, %v193_v44 }
  0xde   :  { %v245_v19 = vmul.f32 0.00390625, %v190_v42  ;;  %v354_v42 = vrot.slane %v307_v21, %v353_v58  ;;  %v309_v26 = vunpack.c.l.b16 %v259_v30  ;;  %v461_v58 = vsel %vm355_vm2, %v460_v43, %v456_v49 }
  0xdf   :  { %v310_v61 = vunpack.c.h.b16 %v259_v30 }
  0xe0   :  { %v151_v1 = vpop.xlane.xlu1 %150  ;;  %v267_v41 = vpack.c.bf16 %v246_v18, %v245_v19  ;;  %v356_v50 = vsel %vm355_vm2, %v354_v42, %v349_v37  ;;  %v368_v63 = vrot.slane %v309_v26, %v1903_v62  ;;  %v1955_v26 = vsub.s32 %v427_v17, %v1795_v51 }
  0xe1   :  { %v148_v47 = vpop.xlane.xlu0 %147  ;;  %v232_v34 = vmul.f32 0.00390625, %v151_v1  ;;  %v363_v21 = vsel %vm362_vm3, %v361_v53, %v356_v50  ;;  %v375_v29 = vrot.slane %v310_v61, %v1909_v13 }
  0xe2   :  { %v231_v35 = vmul.f32 0.00390625, %v148_v47  ;;  %v325_v54 = vunpack.c.l.b16 %v267_v41  ;;  %v326_v11 = vunpack.c.h.b16 %v267_v41 }
  0xe4   :  { %v199_v55 = vpop.xlane.xlu1 %198  ;;  %v260_v1 = vpack.c.bf16 %v232_v34, %v231_v35  ;;  %v470_v12 = vrot.slane %v325_v54, %v1903_v62  ;;  %v370_v62 = vsel %vm369_vm4, %v368_v63, %v363_v21  ;;  %v441_v21 = vadd.s32 4294967176, %v1887_v45 }
  0xe5   :  { %v196_v60 = vpop.xlane.xlu0 %195  ;;  %v248_v46 = vmul.f32 0.00390625, %v199_v55 }
  0xe6   :  { %v247_v6 = vmul.f32 0.00390625, %v196_v60  ;;  %v465_v60 = vrot.slane %v324_v5, %v1900_v59  ;;  %v311_v3 = vunpack.c.l.b16 %v260_v1  ;;  %v312_v30 = vunpack.c.h.b16 %v260_v1 }
  0xe8   :  { %v157_v15 = vpop.xlane.xlu1 %156  ;;  %v268_v55 = vpack.c.bf16 %v248_v46, %v247_v6  ;;  %v466_v24 = vsel %vm362_vm3, %v465_v60, %v461_v58  ;;  %v382_v31 = vrot.slane %v311_v3, %v1912_v14  ;;  %v377_v6 = vsel %vm376_vm5, %v375_v29, %v370_v62 }
  0xe9   :  { %v154_v20 = vpop.xlane.xlu0 %153  ;;  %v234_v47 = vmul.f32 0.00390625, %v157_v15  ;;  %v471_v35 = vsel %vm369_vm4, %v470_v12, %v466_v24  ;;  %v389_v5 = vrot.slane %v312_v30, %v1915_v22  ;;  %v434_v60 = vadd.s32 4294967184, %v1887_v45 }
  0xea   :  { %v233_v25 = vmul.f32 0.00390625, %v154_v20  ;;  %v327_v59 = vunpack.c.l.b16 %v268_v55  ;;  %v328_v38 = vunpack.c.h.b16 %v268_v55  ;;  %v384_v1 = vsel %vm383_vm6, %v382_v31, %v377_v6 }
  0xeb   :  { %v437_v29 = vsub.s32 %v434_v60, %v1795_v51  ;;  %v1467_v60 = vld [vmem:[#allocation8 + $0x30] ss:$8 sps:$4 sm:$0xff]  }
  0xec   :  { %v205_v36 = vpop.xlane.xlu1 %204  ;;  %v261_v4 = vpack.c.bf16 %v234_v47, %v233_v25  ;;  %v480_v41 = vrot.slane %v327_v59, %v1912_v14  ;;  %v485_v52 = vrot.slane %v328_v38, %v1915_v22 }
  0xed   :  { %v202_v44 = vpop.xlane.xlu0 %201  ;;  %v250_v56 = vmul.f32 0.00390625, %v205_v36  ;;  %v475_v36 = vrot.slane %v326_v11, %v1909_v13 }
  0xee   :  { %v249_v57 = vmul.f32 0.00390625, %v202_v44  ;;  %v313_v32 = vunpack.c.l.b16 %v261_v4  ;;  %v314_v43 = vunpack.c.h.b16 %v261_v4 }
  0xef   :  { %v476_v14 = vsel %vm376_vm5, %v475_v36, %v471_v35 }
  0xf0   :  { %v163_v27 = vpop.xlane.xlu1 %162  ;;  %v269_v18 = vpack.c.bf16 %v250_v56, %v249_v57  ;;  %v396_v13 = vrot.slane %v313_v32, %v1918_v23  ;;  %v481_v54 = vsel %vm383_vm6, %v480_v41, %v476_v14  ;;  %v391_v56 = vsel %vm390_vm7, %v389_v5, %v384_v1 }
  0xf1   :  { %v160_v48 = vpop.xlane.xlu0 %159  ;;  %v236_v8 = vmul.f32 0.00390625, %v163_v27  ;;  %v403_v57 = vrot.slane %v314_v43, %v1922_v7  ;;  %v444_v41 = vsub.s32 %v441_v21, %v1795_v51  ;;  %v1494_v21 = vld [vmem:[#allocation8 + $0xc0] ss:$8 sps:$4 sm:$0xff]  }
  0xf2   :  { %v235_v9 = vmul.f32 0.00390625, %v160_v48  ;;  %v329_v44 = vunpack.c.l.b16 %v269_v18  ;;  %v330_v49 = vunpack.c.h.b16 %v269_v18  ;;  %v398_v61 = vsel %vm397_vm8, %v396_v13, %v391_v56  ;;  %v1466_v56 = vld [vmem:[#allocation8 + $0x24] ss:$8 sps:$4 sm:$0xff]  }
  0xf3   :  { %v405_v18 = vsel %vm404_vm9, %v403_v57, %v398_v61  ;;  %v1464_v57 = vld [vmem:[#allocation8 + $0x20] ss:$8 sps:$4 sm:$0xff]   ;;  %v1472_v61 = vld [vmem:[#allocation8 + $0x44] ss:$8 sps:$4 sm:$0xff]  }
  0xf4   :  { %v211_v10 = vpop.xlane.xlu1 %210  ;;  %v262_v33 = vpack.c.bf16 %v236_v8, %v235_v9  ;;  %v490_v48 = vrot.slane %v329_v44, %v1918_v23  ;;  %v486_v8 = vsel %vm390_vm7, %v485_v52, %v481_v54  ;;  %v495_v23 = vrot.slane %v330_v49, %v1922_v7 }
  0xf5   :  { %v208_v15 = vpop.xlane.xlu0 %207  ;;  %v252_v19 = vmul.f32 0.00390625, %v211_v10 }
  0xf6   :  { %v251_v20 = vmul.f32 0.00390625, %v208_v15  ;;  %v315_v47 = vunpack.c.l.b16 %v262_v33  ;;  %v316_v58 = vunpack.c.h.b16 %v262_v33  ;;  %v491_v12 = vsel %vm397_vm8, %v490_v48, %v486_v8  ;;  %v1458_v48 = vld [vmem:[#allocation8] ss:$8 sps:$4 sm:$0xff]  }
  0xf7   :  { %v496_v31 = vsel %vm404_vm9, %v495_v23, %v491_v12  ;;  %v1476_v8 = vld [vmem:[#allocation8 + $0x60] ss:$8 sps:$4 sm:$0xff]   ;;  %v1481_v23 = vld [vmem:[#allocation8 + $0x74] ss:$8 sps:$4 sm:$0xff]  }
  0xf8   :  { %v169_v34 = vpop.xlane.xlu1 %168  ;;  %v270_v42 = vpack.c.bf16 %v252_v19, %v251_v20  ;;  %v410_v22 = vrot.slane %v315_v47, %v1926_v0  ;;  %v417_v19 = vrot.slane %v316_v58, %v1929_v28  ;;  %v1469_v58 = vld [vmem:[#allocation8 + $0x34] ss:$8 sps:$4 sm:$0xff]  }
  0xf9   :  { %v238_v39 = vmul.f32 0.00390625, %v169_v34  ;;  %v166_v40 = vpop.xlane.xlu0 %165  ;;  %v1487_v12 = vld [vmem:[#allocation8 + $0x94] ss:$8 sps:$4 sm:$0xff]  }
  0xfa   :  { %v237_v46 = vmul.f32 0.00390625, %v166_v40  ;;  %v331_v50 = vunpack.c.l.b16 %v270_v42  ;;  %v332_v9 = vunpack.c.h.b16 %v270_v42  ;;  %v412_v24 = vsel %vm411_vm10, %v410_v22, %v405_v18  ;;  %v1470_v22 = vld [vmem:[#allocation8 + $0x40] ss:$8 sps:$4 sm:$0xff]   ;;  %v1493_v18 = vld [vmem:[#allocation8 + $0xb4] ss:$8 sps:$4 sm:$0xff]  }
  0xfc   :  { %v263_v25 = vpack.c.bf16 %v238_v39, %v237_v46  ;;  %v217_v27 = vpop.xlane.xlu1 %216  ;;  %v500_v15 = vrot.slane %v331_v50, %v1926_v0  ;;  %v505_v0 = vrot.slane %v332_v9, %v1929_v28  ;;  %v419_v39 = vsel %vm418_vm11, %v417_v19, %v412_v24  ;;  %v1479_v9 = vld [vmem:[#allocation8 + $0x70] ss:$8 sps:$4 sm:$0xff]   ;;  %v1499_v24 = vld [vmem:[#allocation8 + $0xd4] ss:$8 sps:$4 sm:$0xff]  }
  0xfd   :  { %v254_v37 = vmul.f32 0.00390625, %v217_v27  ;;  %v214_v53 = vpop.xlane.xlu0 %213  ;;  %v1491_v19 = vld [vmem:[#allocation8 + $0xb0] ss:$8 sps:$4 sm:$0xff]  }
  0xfe   :  { %v253_v55 = vmul.f32 0.00390625, %v214_v53  ;;  %v317_v63 = vunpack.c.l.b16 %v263_v25  ;;  %v318_v20 = vunpack.c.h.b16 %v263_v25  ;;  %v501_v35 = vsel %vm411_vm10, %v500_v15, %v496_v31  ;;  %v1485_v15 = vld [vmem:[#allocation8 + $0x90] ss:$8 sps:$4 sm:$0xff]  }
  0xff   :  { %v506_v6 = vsel %vm418_vm11, %v505_v0, %v501_v35  ;;  %v1503_v31 = vld [vmem:[#allocation8 + $0xf0] ss:$8 sps:$4 sm:$0xff]  }
 0x100   :  { %v271_v3 = vpack.c.bf16 %v254_v37, %v253_v55  ;;  %v175_v4 = vpop.xlane.xlu1 %174  ;;  %v424_v7 = vrot.slane %v317_v63, %v1941_v16  ;;  %v431_v40 = vrot.slane %v318_v20, %v1955_v26  ;;  %v1461_v55 = vld [vmem:[#allocation8 + $0x10] ss:$8 sps:$4 sm:$0xff]   ;;  %v1475_v63 = vld [vmem:[#allocation8 + $0x54] ss:$8 sps:$4 sm:$0xff]   ;;  %v1496_v20 = vld [vmem:[#allocation8 + $0xc4] ss:$8 sps:$4 sm:$0xff]  }
 0x101   :  { %v240_v10 = vmul.f32 0.00390625, %v175_v4  ;;  %v172_v11 = vpop.xlane.xlu0 %171  ;;  %v1478_v4 = vld [vmem:[#allocation8 + $0x64] ss:$8 sps:$4 sm:$0xff]  }
 0x102   :  { %v333_v17 = vunpack.c.l.b16 %v271_v3  ;;  %v239_v59 = vmul.f32 0.00390625, %v172_v11  ;;  %v334_v32 = vunpack.c.h.b16 %v271_v3  ;;  %v426_v42 = vsel %vm425_vm12, %v424_v7, %v419_v39  ;;  %v1473_v3 = vld [vmem:[#allocation8 + $0x50] ss:$8 sps:$4 sm:$0xff]   ;;  %v1482_v11 = vld [vmem:[#allocation8 + $0x80] ss:$8 sps:$4 sm:$0xff]  }
 0x103   :  { %v433_v47 = vsel %vm432_vm13, %v431_v40, %v426_v42  ;;  %v1497_v7 = vld [vmem:[#allocation8 + $0xd0] ss:$8 sps:$4 sm:$0xff]  }
 0x104   :  { %v264_v30 = vpack.c.bf16 %v240_v10, %v239_v59  ;;  %v223_v62 = vpop.xlane.xlu1 %222  ;;  %v510_v36 = vrot.slane %v333_v17, %v1941_v16  ;;  %v515_v5 = vrot.slane %v334_v32, %v1955_v26  ;;  %v1463_v26 = vld [vmem:[#allocation8 + $0x14] ss:$8 sps:$4 sm:$0xff]   ;;  %v1484_v10 = vld [vmem:[#allocation8 + $0x84] ss:$8 sps:$4 sm:$0xff]   ;;  %v1488_v59 = vld [vmem:[#allocation8 + $0xa0] ss:$8 sps:$4 sm:$0xff]  }
 0x105   :  { %v256_v33 = vmul.f32 0.00390625, %v223_v62  ;;  %v220_v34 = vpop.xlane.xlu0 %219  ;;  %v1490_v17 = vld [vmem:[#allocation8 + $0xa4] ss:$8 sps:$4 sm:$0xff]   ;;  %v1505_v62 = vld [vmem:[#allocation8 + $0xf4] ss:$8 sps:$4 sm:$0xff]  }
 0x106   :  { %v319_v45 = vunpack.c.l.b16 %v264_v30  ;;  %v255_v38 = vmul.f32 0.00390625, %v220_v34  ;;  %v320_v44 = vunpack.c.h.b16 %v264_v30  ;;  %v511_v16 = vsel %vm425_vm12, %v510_v36, %v506_v6  ;;  %v1500_v30 = vld [vmem:[#allocation8 + $0xe0] ss:$8 sps:$4 sm:$0xff]  }
 0x107   :  { %v516_v52 = vsel %vm432_vm13, %v515_v5, %v511_v16  ;;  %v1994_v5 = vsub.s32 1, %v1795_v51 }
 0x108   :  { %v438_v46 = vrot.slane %v319_v45, %v437_v29  ;;  %v272_v28 = vpack.c.bf16 %v256_v33, %v255_v38  ;;  %v445_v13 = vrot.slane %v320_v44, %v444_v41 }
 0x10a   :  { %v335_v43 = vunpack.c.l.b16 %v272_v28  ;;  %v336_v1 = vunpack.c.h.b16 %v272_v28  ;;  %v440_v14 = vsel %vm439_vm14, %v438_v46, %v433_v47  ;;  %v1990_v46 = vsub.s32 0, %v1795_v51 }
 0x10b   :  { %v447_v37 = vsel %vm446_vm15, %v445_v13, %v440_v14 }
 0x10c   :  { %v520_v25 = vrot.slane %v335_v43, %v437_v29  ;;  %v525_v27 = vrot.slane %v336_v1, %v444_v41  ;;  %v1502_v29 = vld [vmem:[#allocation8 + $0xe4] ss:$8 sps:$4 sm:$0xff]   ;;  %v759_v43 = vstv %s2103_s4  ;;  %s1688_s4 = smov [#allocation9]  }
 0x10d   :  { %s1351_s10 = sshll.u32 %s1688_s4, 4  ;;  %s1352_s10 = int_to_ptr.vmem [resolvable:$true] %s1351_s10 }
 0x10e   :  { %v521_v49 = vsel %vm439_vm14, %v520_v25, %v516_v52  ;;  %s1648_s11 = scalar_lea.vmem %s1352_s10, 8192  ;;  %p1653_p11 = scmp.lt.s32.totalorder %s1352_s10, %s1352_s10 }
 0x10f   :  { %v526_v53 = vsel %vm446_vm15, %v525_v27, %v521_v49  ;;  %p1649_p10 = scmp.ne.s32.totalorder %s1352_s10, %s1648_s11  ;;  %p1654_p12 = scmp.lt.s32.totalorder %s1648_s11, %s1648_s11 }
 0x110   :  { %v528_v54 = vsel %vm527_vm0, %v526_v53, %v447_v37 }
 0x111   :  { %v529_v50 = vpack.c.b16 %v528_v54, %v528_v54  ;;  %p1655_p13 = por %p1654_p12, %p1653_p11 }
 0x113   :  { %1434 = vmatmul.mubr.bf16.vlgmr.msra.gmra.mrb[0].mxu0 %v529_v50  ;;  %p1656_p0 = pnand %p1655_p13, %p1649_p10 }
 0x114   :  { %921 = vmatpush1.bf16.msra.mxu0 %v1458_v48 }
 0x115   :  { %922 = vmatprep.subr.bf16.mxu0 %v1463_v26 }
 0x118   :  { %923 = vmatpush1.bf16.msra.mxu0 %v1461_v55 }
 0x119   :  { %924 = vmatprep.subr.bf16.mxu0 %v1466_v56 }
 0x11c   :  { %925 = vmatpush1.bf16.msra.mxu0 %v1464_v57 }
 0x11d   :  { %926 = vmatprep.subr.bf16.mxu0 %v1469_v58 }
 0x120   :  { %927 = vmatpush1.bf16.msra.mxu0 %v1467_v60 }
 0x121   :  { %928 = vmatprep.subr.bf16.mxu0 %v1472_v61 }
 0x124   :  { %929 = vmatpush1.bf16.msra.mxu0 %v1470_v22 }
 0x125   :  { %930 = vmatprep.subr.bf16.mxu0 %v1475_v63 }
 0x128   :  { %931 = vmatpush1.bf16.msra.mxu0 %v1473_v3 }
 0x129   :  { %932 = vmatprep.subr.bf16.mxu0 %v1478_v4 }
 0x12c   :  { %933 = vmatpush1.bf16.msra.mxu0 %v1476_v8 }
 0x12d   :  { %934 = vmatprep.subr.bf16.mxu0 %v1481_v23 }
 0x130   :  { %935 = vmatpush1.bf16.msra.mxu0 %v1479_v9  ;;  %v1518_v9 = vld [vmem:[#allocation3 + $0x10] sm:$0xff] }
 0x131   :  { %936 = vmatprep.subr.bf16.mxu0 %v1484_v10 }
 0x134   :  { %937 = vmatpush1.bf16.msra.mxu0 %v1482_v11  ;;  %v1519_v11 = vld [vmem:[#allocation3 + $0x18] sm:$0xff] }
 0x135   :  { %938 = vmatprep.subr.bf16.mxu0 %v1487_v12 }
 0x138   :  { %939 = vmatpush1.bf16.msra.mxu0 %v1485_v15  ;;  %v1520_v15 = vld [vmem:[#allocation3] sm:$0xff] }
 0x139   :  { %940 = vmatprep.subr.bf16.mxu0 %v1490_v17 }
 0x13c   :  { %941 = vmatpush1.bf16.msra.mxu0 %v1488_v59  ;;  %v1521_v59 = vld [vmem:[#allocation3 + $0x8] sm:$0xff] }
 0x13d   :  { %942 = vmatprep.subr.bf16.mxu0 %v1493_v18 }
 0x140   :  { %943 = vmatpush1.bf16.msra.mxu0 %v1491_v19 }
 0x141   :  { %944 = vmatprep.subr.bf16.mxu0 %v1496_v20 }
 0x144   :  { %945 = vmatpush1.bf16.msra.mxu0 %v1494_v21 }
 0x145   :  { %946 = vmatprep.subr.bf16.mxu0 %v1499_v24 }
 0x148   :  { %947 = vmatpush1.bf16.msra.mxu0 %v1497_v7 }
 0x149   :  { %948 = vmatprep.subr.bf16.mxu0 %v1502_v29 }
 0x14c   :  { %949 = vmatpush1.bf16.msra.mxu0 %v1500_v30  ;;  %v1522_v30 = vld [vmem:[#allocation3 + $0x20] sm:$0xff] }
 0x14d   :  { %950 = vmatprep.subr.bf16.mxu0 %v1505_v62 }
 0x150   :  { %951 = vmatpush1.bf16.msra.mxu0 %v1503_v31  ;;  %v1523_v31 = vld [vmem:[#allocation3 + $0x28] sm:$0xff] }
 0x151   :  { %v717_v0 = vpop.f32.mrb[0].mxu1 }
 0x152   :  { %v724_v32 = vpack.c.bf16 %v717_v0, %v717_v0  ;;  %v719_v33 = vpop.f32.mrb[1].mxu1 }
 0x153   :  { %v725_v34 = vpack.c.bf16 %v719_v33, %v719_v33  ;;  %v721_v35 = vpop.f32.mrb[2].mxu1 }
 0x154   :  { %v722_v36 = vpop.f32.mrb[3].mxu1 }
 0x155   :  { %952 = vmatprep.mubr.bf16.mxu0 %v725_v34  ;;  %v1525_v34 = vld [vmem:[#allocation3 + $0x48] sm:$0xff] }
 0x156   :  { %953 = vmatmul.mubr.bf16.vlgmr.msra.gmra.mrb[4].mxu0 %v724_v32  ;;  %v1524_v32 = vld [vmem:[#allocation3 + $0x40] sm:$0xff] }
 0x1e6   :  { %v613_v45 = vpop.f32.mrb[0].mxu0 }
 0x1e7   :  { %v1372_v38 = vmul.f32 -1.442695, %v613_v45  ;;  %v1435_v39 = vpop.f32.mrb[1].mxu0 }
 0x1e8   :  { %v616_v40 = vpop.f32.mrb[2].mxu0 }
 0x1e9   :  { %1506 = vpow2.f32 %v1372_v38  ;;  %v1436_v41 = vpop.f32.mrb[3].mxu0 }
 0x1f3   :  { %v1507_v44 = vpop.eup %1506 }
 0x1f4   :  { %v622_v42 = vadd.f32 1.0, %v1507_v44  ;;  %v1526_v44 = vld [vmem:[#allocation3 + $0x30] sm:$0xff] }
 0x1f6   :  { %1508 = vrcp.f32 %v622_v42 }
 0x200   :  { %v1509_v28 = vpop.eup %1508 }
 0x201   :  { %v978_v6 = vrot.slane %v1509_v28, %v1990_v46  ;;  %v1045_v16 = vrot.slane %v1509_v28, %v1994_v5  ;;  %v1527_v28 = vld [vmem:[#allocation3 + $0x38] sm:$0xff] }
 0x203   :  { %984 = vbcast.lane.b32.xlu1 %v978_v6, 264  ;;  %980 = vbcast.lane.b32.xlu0 %v978_v6, 256 }
 0x207   :  { %988 = vbcast.lane.b32.xlu1 %v978_v6, 272  ;;  %996 = vbcast.lane.b32.xlu0 %v978_v6, 288 }
 0x20b   :  { %992 = vbcast.lane.b32.xlu1 %v978_v6, 280  ;;  %1004 = vbcast.lane.b32.xlu0 %v978_v6, 304 }
 0x20f   :  { %1000 = vbcast.lane.b32.xlu1 %v978_v6, 296  ;;  %1012 = vbcast.lane.b32.xlu0 %v978_v6, 320 }
 0x213   :  { %1008 = vbcast.lane.b32.xlu1 %v978_v6, 312  ;;  %1020 = vbcast.lane.b32.xlu0 %v978_v6, 336 }
 0x217   :  { %1016 = vbcast.lane.b32.xlu1 %v978_v6, 328  ;;  %1028 = vbcast.lane.b32.xlu0 %v978_v6, 352 }
 0x21b   :  { %1024 = vbcast.lane.b32.xlu1 %v978_v6, 344  ;;  %1036 = vbcast.lane.b32.xlu0 %v978_v6, 368 }
 0x21f   :  { %1032 = vbcast.lane.b32.xlu1 %v978_v6, 360  ;;  %1047 = vbcast.lane.b32.xlu0 %v1045_v16, 256 }
 0x223   :  { %1040 = vbcast.lane.b32.xlu1 %v978_v6, 376  ;;  %1055 = vbcast.lane.b32.xlu0 %v1045_v16, 272 }
 0x227   :  { %1051 = vbcast.lane.b32.xlu1 %v1045_v16, 264  ;;  %1063 = vbcast.lane.b32.xlu0 %v1045_v16, 288 }
 0x229   :  { %v954_v1 = vpop.f32.mrb[4].mxu0 }
 0x22a   :  { %v955_v13 = vadd.f32 %v954_v1, %v759_v43  ;;  %v956_v47 = vpop.f32.mrb[5].mxu0  ;;  %v1529_v1 = vld [vmem:[#allocation3 + $0x68] sm:$0xff] }
 0x22b   :  { %v957_v25 = vadd.f32 %v956_v47, %v759_v43  ;;  %v958_v51 = vpop.f32.mrb[6].mxu0  ;;  %1059 = vbcast.lane.b32.xlu1 %v1045_v16, 280  ;;  %1071 = vbcast.lane.b32.xlu0 %v1045_v16, 304 }
 0x22c   :  { %v961_v27 = vmax.f32 %v955_v13, 0.0  ;;  %v959_v14 = vpop.f32.mrb[7].mxu0 }
 0x22d   :  { %v962_v52 = vmax.f32 %v957_v25, 0.0 }
 0x22e   :  { %v1406_v49 = vmul.f32 -1.442695, %v961_v27 }
 0x22f   :  { %v1407_v37 = vmul.f32 -1.442695, %v962_v52  ;;  %1067 = vbcast.lane.b32.xlu1 %v1045_v16, 296  ;;  %1079 = vbcast.lane.b32.xlu0 %v1045_v16, 320 }
 0x230   :  { %1510 = vpow2.f32 %v1406_v49  ;;  %v1530_v49 = vld [vmem:[#allocation3 + $0x50] sm:$0xff] }
 0x231   :  { %1512 = vpow2.f32 %v1407_v37 }
 0x233   :  { %1075 = vbcast.lane.b32.xlu1 %v1045_v16, 312  ;;  %1087 = vbcast.lane.b32.xlu0 %v1045_v16, 336 }
 0x237   :  { %1083 = vbcast.lane.b32.xlu1 %v1045_v16, 328  ;;  %1095 = vbcast.lane.b32.xlu0 %v1045_v16, 352 }
 0x23a   :  { %v1511_v53 = vpop.eup %1510 }
 0x23b   :  { %v1513_v54 = vpop.eup %1512  ;;  %v969_v48 = vadd.f32 1.0, %v1511_v53  ;;  %1091 = vbcast.lane.b32.xlu1 %v1045_v16, 344  ;;  %1103 = vbcast.lane.b32.xlu0 %v1045_v16, 368  ;;  %v1531_v53 = vld [vmem:[#allocation3 + $0x58] sm:$0xff] }
 0x23c   :  { %v970_v50 = vadd.f32 1.0, %v1513_v54 }
 0x23d   :  { %1514 = vrcp.f32 %v969_v48  ;;  %v1532_v48 = vld [vmem:[#allocation3 + $0x80] sm:$0xff] }
 0x23e   :  { %1516 = vrcp.f32 %v970_v50 }
 0x23f   :  { %1099 = vbcast.lane.b32.xlu1 %v1045_v16, 360 }
 0x243   :  { %1107 = vbcast.lane.b32.xlu1 %v1045_v16, 376  ;;  %v1528_v16 = vld [vmem:[#allocation3 + $0x60] sm:$0xff] }
 0x247   :  { %v1515_v26 = vpop.eup %1514 }
 0x248   :  { %v1517_v55 = vpop.eup %1516 }
 0x249   :  { %v1111_v56 = vcombine.low %v1515_v26, %v1517_v55  ;;  %v1533_v26 = vld [vmem:[#allocation3 + $0x88] sm:$0xff] }
 0x24b   :  { %v2001_v57 = vrot.slane %v1111_v56, %v1810_v2 }
 0x24d   :  { %v1126_v58 = vrot.slane %v2001_v57, %v1810_v2  ;;  %v1119_v56 = vcombine.high %v2001_v57, %v2001_v57 }
 0x24f   :  { %v2006_v60 = vrot.slane %v1126_v58, %v1990_v46  ;;  %v2009_v61 = vrot.slane %v1126_v58, %v1994_v5 }
 0x275   :  { %v985_v22 = vpop.permute.xlu1 %984  ;;  %v981_v63 = vpop.permute.xlu0 %980 }
 0x276   :  { %v1156_v3 = vadd.f32 %v2006_v60, %v985_v22  ;;  %v1157_v4 = vadd.f32 %v2009_v61, %v985_v22  ;;  %v1154_v8 = vadd.f32 %v2006_v60, %v981_v63  ;;  %v1155_v23 = vadd.f32 %v2009_v61, %v981_v63 }
 0x278   :  { %v1220_v10 = vmul.f32 %v1518_v9, %v1156_v3  ;;  %v1221_v12 = vmul.f32 %v1519_v11, %v1157_v4  ;;  %v1218_v17 = vmul.f32 %v1520_v15, %v1154_v8  ;;  %v1219_v18 = vmul.f32 %v1521_v59, %v1155_v23  ;;  %v1534_v23 = vld [vmem:[#allocation3 + $0x70] sm:$0xff]  ;;  %v1537_v15 = vld [vmem:[#allocation3 + $0xa8] sm:$0xff] }
 0x279   :  { %v989_v19 = vpop.permute.xlu1 %988  ;;  %v997_v20 = vpop.permute.xlu0 %996  ;;  %v1133_v59 = vrot.slane %v1119_v56, %v1810_v2 }
 0x27a   :  { %1284 = vst [vmem:[#allocation9 + $0x10] sm:$0xff] %v1220_v10  ;;  %1285 = vst [vmem:[#allocation9 + $0x18] sm:$0xff] %v1221_v12  ;;  %v1158_v21 = vadd.f32 %v2006_v60, %v989_v19  ;;  %v1159_v24 = vadd.f32 %v2009_v61, %v989_v19  ;;  %v1162_v7 = vadd.f32 %v2006_v60, %v997_v20  ;;  %v1535_v10 = vld [vmem:[#allocation3 + $0x78] sm:$0xff]  ;;  %v1536_v12 = vld [vmem:[#allocation3 + $0xa0] sm:$0xff] }
 0x27b   :  { %1282 = vst [vmem:[#allocation9] sm:$0xff] %v1218_v17  ;;  %1283 = vst [vmem:[#allocation9 + $0x8] sm:$0xff] %v1219_v18  ;;  %v1163_v29 = vadd.f32 %v2009_v61, %v997_v20 }
 0x27c   :  { %v1222_v62 = vmul.f32 %v1522_v30, %v1158_v21  ;;  %v1223_v0 = vmul.f32 %v1523_v31, %v1159_v24  ;;  %v1226_v33 = vmul.f32 %v1524_v32, %v1162_v7  ;;  %v1541_v32 = vld [vmem:[#allocation3 + $0xc8] sm:$0xff] }
 0x27d   :  { %v1227_v35 = vmul.f32 %v1525_v34, %v1163_v29  ;;  %v993_v36 = vpop.permute.xlu1 %992  ;;  %v1005_v45 = vpop.permute.xlu0 %1004  ;;  %v1538_v29 = vld [vmem:[#allocation3 + $0x90] sm:$0xff]  ;;  %v2039_v34 = vrot.slane %v1133_v59, %v1990_v46 }
 0x27e   :  { %1286 = vst [vmem:[#allocation9 + $0x20] sm:$0xff] %v1222_v62  ;;  %1287 = vst [vmem:[#allocation9 + $0x28] sm:$0xff] %v1223_v0  ;;  %v1160_v38 = vadd.f32 %v2006_v60, %v993_v36  ;;  %v1161_v39 = vadd.f32 %v2009_v61, %v993_v36  ;;  %v1166_v40 = vadd.f32 %v2006_v60, %v1005_v45  ;;  %v1539_v62 = vld [vmem:[#allocation3 + $0x98] sm:$0xff]  ;;  %v1540_v0 = vld [vmem:[#allocation3 + $0xc0] sm:$0xff] }
 0x27f   :  { %1290 = vst [vmem:[#allocation9 + $0x40] sm:$0xff] %v1226_v33  ;;  %1291 = vst [vmem:[#allocation9 + $0x48] sm:$0xff] %v1227_v35  ;;  %v1167_v41 = vadd.f32 %v2009_v61, %v1005_v45  ;;  %v2042_v35 = vrot.slane %v1133_v59, %v1994_v5  ;;  %v1544_v5 = vld [vmem:[#allocation3 + $0xe0] sm:$0xff] }
 0x280   :  { %v1224_v42 = vmul.f32 %v1526_v44, %v1160_v38  ;;  %v1225_v6 = vmul.f32 %v1527_v28, %v1161_v39  ;;  %v1230_v43 = vmul.f32 %v1528_v16, %v1166_v40  ;;  %v1542_v44 = vld [vmem:[#allocation3 + $0xb0] sm:$0xff]  ;;  %v1545_v16 = vld [vmem:[#allocation3 + $0xe8] sm:$0xff] }
 0x281   :  { %v1231_v13 = vmul.f32 %v1529_v1, %v1167_v41  ;;  %v1001_v47 = vpop.permute.xlu1 %1000  ;;  %v1013_v25 = vpop.permute.xlu0 %1012 }
 0x282   :  { %1288 = vst [vmem:[#allocation9 + $0x30] sm:$0xff] %v1224_v42  ;;  %1289 = vst [vmem:[#allocation9 + $0x38] sm:$0xff] %v1225_v6  ;;  %v1164_v51 = vadd.f32 %v2006_v60, %v1001_v47  ;;  %v1165_v27 = vadd.f32 %v2009_v61, %v1001_v47  ;;  %v1170_v14 = vadd.f32 %v2006_v60, %v1013_v25  ;;  %v1543_v42 = vld [vmem:[#allocation3 + $0xb8] sm:$0xff] }
 0x283   :  { %1294 = vst [vmem:[#allocation9 + $0x60] sm:$0xff] %v1230_v43  ;;  %1295 = vst [vmem:[#allocation9 + $0x68] sm:$0xff] %v1231_v13  ;;  %v1171_v52 = vadd.f32 %v2009_v61, %v1013_v25 }
 0x284   :  { %v1228_v37 = vmul.f32 %v1530_v49, %v1164_v51  ;;  %v1229_v54 = vmul.f32 %v1531_v53, %v1165_v27  ;;  %v1234_v50 = vmul.f32 %v1532_v48, %v1170_v14  ;;  %v1546_v14 = vld [vmem:[#allocation3 + $0xd0] sm:$0xff]  ;;  %v1547_v49 = vld [vmem:[#allocation3 + $0xd8] sm:$0xff]  ;;  %v1548_v53 = vld [vmem:[#allocation3 + $0x100] sm:$0xff] }
 0x285   :  { %v1235_v55 = vmul.f32 %v1533_v26, %v1171_v52  ;;  %v1009_v58 = vpop.permute.xlu1 %1008  ;;  %v1021_v22 = vpop.permute.xlu0 %1020  ;;  %v1549_v48 = vld [vmem:[#allocation3 + $0x108] sm:$0xff] }
 0x286   :  { %1292 = vst [vmem:[#allocation9 + $0x50] sm:$0xff] %v1228_v37  ;;  %1293 = vst [vmem:[#allocation9 + $0x58] sm:$0xff] %v1229_v54  ;;  %v1168_v63 = vadd.f32 %v2006_v60, %v1009_v58  ;;  %v1169_v3 = vadd.f32 %v2009_v61, %v1009_v58  ;;  %v1174_v4 = vadd.f32 %v2006_v60, %v1021_v22 }
 0x287   :  { %1298 = vst [vmem:[#allocation9 + $0x80] sm:$0xff] %v1234_v50  ;;  %1299 = vst [vmem:[#allocation9 + $0x88] sm:$0xff] %v1235_v55  ;;  %v1175_v8 = vadd.f32 %v2009_v61, %v1021_v22 }
 0x288   :  { %v1232_v9 = vmul.f32 %v1534_v23, %v1168_v63  ;;  %v1233_v11 = vmul.f32 %v1535_v10, %v1169_v3  ;;  %v1238_v57 = vmul.f32 %v1536_v12, %v1174_v4  ;;  %v1550_v3 = vld [vmem:[#allocation3 + $0xf0] sm:$0xff] }
 0x289   :  { %v1239_v17 = vmul.f32 %v1537_v15, %v1175_v8  ;;  %v1017_v18 = vpop.permute.xlu1 %1016  ;;  %v1029_v19 = vpop.permute.xlu0 %1028  ;;  %v1551_v8 = vld [vmem:[#allocation3 + $0xf8] sm:$0xff] }
 0x28a   :  { %1296 = vst [vmem:[#allocation9 + $0x70] sm:$0xff] %v1232_v9  ;;  %1297 = vst [vmem:[#allocation9 + $0x78] sm:$0xff] %v1233_v11  ;;  %v1172_v20 = vadd.f32 %v2006_v60, %v1017_v18  ;;  %v1173_v21 = vadd.f32 %v2009_v61, %v1017_v18  ;;  %v1178_v24 = vadd.f32 %v2006_v60, %v1029_v19  ;;  %v1552_v9 = vld [vmem:[#allocation3 + $0x120] sm:$0xff]  ;;  %v1553_v11 = vld [vmem:[#allocation3 + $0x128] sm:$0xff] }
 0x28b   :  { %1302 = vst [vmem:[#allocation9 + $0xa0] sm:$0xff] %v1238_v57  ;;  %1303 = vst [vmem:[#allocation9 + $0xa8] sm:$0xff] %v1239_v17  ;;  %v1179_v7 = vadd.f32 %v2009_v61, %v1029_v19  ;;  %v1554_v18 = vld [vmem:[#allocation3 + $0x110] sm:$0xff] }
 0x28c   :  { %v1236_v30 = vmul.f32 %v1538_v29, %v1172_v20  ;;  %v1237_v31 = vmul.f32 %v1539_v62, %v1173_v21  ;;  %v1242_v2 = vmul.f32 %v1540_v0, %v1178_v24  ;;  %v1555_v20 = vld [vmem:[#allocation3 + $0x118] sm:$0xff]  ;;  %v1556_v24 = vld [vmem:[#allocation3 + $0x140] sm:$0xff]  ;;  %v1557_v29 = vld [vmem:[#allocation3 + $0x148] sm:$0xff] }
 0x28d   :  { %v1243_v33 = vmul.f32 %v1541_v32, %v1179_v7  ;;  %v1025_v36 = vpop.permute.xlu1 %1024  ;;  %v1037_v45 = vpop.permute.xlu0 %1036 }
 0x28e   :  { %1300 = vst [vmem:[#allocation9 + $0x90] sm:$0xff] %v1236_v30  ;;  %1301 = vst [vmem:[#allocation9 + $0x98] sm:$0xff] %v1237_v31  ;;  %v1176_v38 = vadd.f32 %v2006_v60, %v1025_v36  ;;  %v1177_v39 = vadd.f32 %v2009_v61, %v1025_v36  ;;  %v1182_v40 = vadd.f32 %v2006_v60, %v1037_v45  ;;  %v1558_v36 = vld [vmem:[#allocation3 + $0x130] sm:$0xff] }
 0x28f   :  { %1306 = vst [vmem:[#allocation9 + $0xc0] sm:$0xff] %v1242_v2  ;;  %1307 = vst [vmem:[#allocation9 + $0xc8] sm:$0xff] %v1243_v33  ;;  %v1183_v41 = vadd.f32 %v2009_v61, %v1037_v45 }
 0x290   :  { %v1240_v46 = vmul.f32 %v1542_v44, %v1176_v38  ;;  %v1241_v28 = vmul.f32 %v1543_v42, %v1177_v39  ;;  %v1246_v6 = vmul.f32 %v1544_v5, %v1182_v40  ;;  %v1559_v38 = vld [vmem:[#allocation3 + $0x138] sm:$0xff]  ;;  %v1560_v40 = vld [vmem:[#allocation3 + $0x160] sm:$0xff]  ;;  %v1561_v44 = vld [vmem:[#allocation3 + $0x168] sm:$0xff] }
 0x291   :  { %v1247_v43 = vmul.f32 %v1545_v16, %v1183_v41  ;;  %v1033_v1 = vpop.permute.xlu1 %1032  ;;  %v1048_v13 = vpop.permute.xlu0 %1047 }
 0x292   :  { %1304 = vst [vmem:[#allocation9 + $0xb0] sm:$0xff] %v1240_v46  ;;  %1305 = vst [vmem:[#allocation9 + $0xb8] sm:$0xff] %v1241_v28  ;;  %v1180_v47 = vadd.f32 %v2006_v60, %v1033_v1  ;;  %v1181_v25 = vadd.f32 %v2009_v61, %v1033_v1  ;;  %v1186_v51 = vadd.f32 %v2039_v34, %v1048_v13  ;;  %v1562_v1 = vld [vmem:[#allocation3 + $0x150] sm:$0xff] }
 0x293   :  { %1310 = vst [vmem:[#allocation9 + $0xe0] sm:$0xff] %v1246_v6  ;;  %1311 = vst [vmem:[#allocation9 + $0xe8] sm:$0xff] %v1247_v43  ;;  %v1187_v27 = vadd.f32 %v2042_v35, %v1048_v13 }
 0x294   :  { %v1244_v52 = vmul.f32 %v1546_v14, %v1180_v47  ;;  %v1245_v37 = vmul.f32 %v1547_v49, %v1181_v25  ;;  %v1250_v54 = vmul.f32 %v1548_v53, %v1186_v51  ;;  %v1563_v47 = vld [vmem:[#allocation3 + $0x158] sm:$0xff]  ;;  %v1564_v51 = vld [vmem:[#allocation3 + $0x180] sm:$0xff]  ;;  %v1565_v14 = vld [vmem:[#allocation3 + $0x188] sm:$0xff] }
 0x295   :  { %v1251_v50 = vmul.f32 %v1549_v48, %v1187_v27  ;;  %v1041_v26 = vpop.permute.xlu1 %1040  ;;  %v1056_v55 = vpop.permute.xlu0 %1055 }
 0x296   :  { %1308 = vst [vmem:[#allocation9 + $0xd0] sm:$0xff] %v1244_v52  ;;  %1309 = vst [vmem:[#allocation9 + $0xd8] sm:$0xff] %v1245_v37  ;;  %v1184_v56 = vadd.f32 %v2006_v60, %v1041_v26  ;;  %v1185_v58 = vadd.f32 %v2009_v61, %v1041_v26  ;;  %v1190_v22 = vadd.f32 %v2039_v34, %v1056_v55  ;;  %v1566_v26 = vld [vmem:[#allocation3 + $0x170] sm:$0xff] }
 0x297   :  { %1314 = vst [vmem:[#allocation9 + $0x100] sm:$0xff] %v1250_v54  ;;  %1315 = vst [vmem:[#allocation9 + $0x108] sm:$0xff] %v1251_v50  ;;  %v1191_v63 = vadd.f32 %v2042_v35, %v1056_v55 }
 0x298   :  { %v1248_v4 = vmul.f32 %v1550_v3, %v1184_v56  ;;  %v1249_v23 = vmul.f32 %v1551_v8, %v1185_v58  ;;  %v1254_v10 = vmul.f32 %v1552_v9, %v1190_v22  ;;  %v1567_v56 = vld [vmem:[#allocation3 + $0x178] sm:$0xff]  ;;  %v1568_v22 = vld [vmem:[#allocation3 + $0x1a0] sm:$0xff]  ;;  %v1569_v3 = vld [vmem:[#allocation3 + $0x1a8] sm:$0xff] }
 0x299   :  { %v1255_v12 = vmul.f32 %v1553_v11, %v1191_v63  ;;  %v1052_v57 = vpop.permute.xlu1 %1051  ;;  %v1064_v15 = vpop.permute.xlu0 %1063 }
 0x29a   :  { %1312 = vst [vmem:[#allocation9 + $0xf0] sm:$0xff] %v1248_v4  ;;  %1313 = vst [vmem:[#allocation9 + $0xf8] sm:$0xff] %v1249_v23  ;;  %v1188_v60 = vadd.f32 %v2039_v34, %v1052_v57  ;;  %v1189_v61 = vadd.f32 %v2042_v35, %v1052_v57  ;;  %v1194_v17 = vadd.f32 %v2039_v34, %v1064_v15  ;;  %v1570_v57 = vld [vmem:[#allocation3 + $0x190] sm:$0xff] }
 0x29b   :  { %1318 = vst [vmem:[#allocation9 + $0x120] sm:$0xff] %v1254_v10  ;;  %1319 = vst [vmem:[#allocation9 + $0x128] sm:$0xff] %v1255_v12  ;;  %v1195_v59 = vadd.f32 %v2042_v35, %v1064_v15 }
 0x29c   :  { %v1252_v19 = vmul.f32 %v1554_v18, %v1188_v60  ;;  %v1253_v21 = vmul.f32 %v1555_v20, %v1189_v61  ;;  %v1258_v7 = vmul.f32 %v1556_v24, %v1194_v17  ;;  %v1571_v60 = vld [vmem:[#allocation3 + $0x198] sm:$0xff]  ;;  %v1572_v17 = vld [vmem:[#allocation3 + $0x1c0] sm:$0xff]  ;;  %v1573_v18 = vld [vmem:[#allocation3 + $0x1c8] sm:$0xff] }
 0x29d   :  { %v1259_v30 = vmul.f32 %v1557_v29, %v1195_v59  ;;  %v1060_v62 = vpop.permute.xlu1 %1059  ;;  %v1072_v31 = vpop.permute.xlu0 %1071 }
 0x29e   :  { %1316 = vst [vmem:[#allocation9 + $0x110] sm:$0xff] %v1252_v19  ;;  %1317 = vst [vmem:[#allocation9 + $0x118] sm:$0xff] %v1253_v21  ;;  %v1192_v0 = vadd.f32 %v2039_v34, %v1060_v62  ;;  %v1193_v2 = vadd.f32 %v2042_v35, %v1060_v62  ;;  %v1198_v32 = vadd.f32 %v2039_v34, %v1072_v31  ;;  %v1574_v62 = vld [vmem:[#allocation3 + $0x1b0] sm:$0xff] }
 0x29f   :  { %1322 = vst [vmem:[#allocation9 + $0x140] sm:$0xff] %v1258_v7  ;;  %1323 = vst [vmem:[#allocation9 + $0x148] sm:$0xff] %v1259_v30  ;;  %v1199_v33 = vadd.f32 %v2042_v35, %v1072_v31 }
 0x2a0   :  { %v1256_v45 = vmul.f32 %v1558_v36, %v1192_v0  ;;  %v1257_v39 = vmul.f32 %v1559_v38, %v1193_v2  ;;  %v1262_v41 = vmul.f32 %v1560_v40, %v1198_v32  ;;  %v1575_v0 = vld [vmem:[#allocation3 + $0x1b8] sm:$0xff]  ;;  %v1576_v32 = vld [vmem:[#allocation3 + $0x1e0] sm:$0xff]  ;;  %v1577_v36 = vld [vmem:[#allocation3 + $0x1e8] sm:$0xff] }
 0x2a1   :  { %v1263_v46 = vmul.f32 %v1561_v44, %v1199_v33  ;;  %v1068_v42 = vpop.permute.xlu1 %1067  ;;  %v1080_v28 = vpop.permute.xlu0 %1079 }
 0x2a2   :  { %1320 = vst [vmem:[#allocation9 + $0x130] sm:$0xff] %v1256_v45  ;;  %1321 = vst [vmem:[#allocation9 + $0x138] sm:$0xff] %v1257_v39  ;;  %v1196_v5 = vadd.f32 %v2039_v34, %v1068_v42  ;;  %v1197_v6 = vadd.f32 %v2042_v35, %v1068_v42  ;;  %v1202_v16 = vadd.f32 %v2039_v34, %v1080_v28 }
 0x2a3   :  { %1326 = vst [vmem:[#allocation9 + $0x160] sm:$0xff] %v1262_v41  ;;  %1327 = vst [vmem:[#allocation9 + $0x168] sm:$0xff] %v1263_v46  ;;  %v1203_v43 = vadd.f32 %v2042_v35, %v1080_v28  ;;  %v1578_v41 = vld [vmem:[#allocation3 + $0x1d0] sm:$0xff]  ;;  %v1579_v46 = vld [vmem:[#allocation3 + $0x1d8] sm:$0xff] }
 0x2a4   :  { %v1260_v13 = vmul.f32 %v1562_v1, %v1196_v5  ;;  %v1261_v25 = vmul.f32 %v1563_v47, %v1197_v6  ;;  %v1266_v27 = vmul.f32 %v1564_v51, %v1202_v16  ;;  %v1580_v16 = vld [vmem:[#allocation3 + $0x1f0] sm:$0xff]  ;;  %v1581_v1 = vld [vmem:[#allocation3 + $0x1f8] sm:$0xff] }
 0x2a5   :  { %v1267_v52 = vmul.f32 %v1565_v14, %v1203_v43  ;;  %v1076_v49 = vpop.permute.xlu1 %1075  ;;  %v1088_v37 = vpop.permute.xlu0 %1087 }
 0x2a6   :  { %1324 = vst [vmem:[#allocation9 + $0x150] sm:$0xff] %v1260_v13  ;;  %1325 = vst [vmem:[#allocation9 + $0x158] sm:$0xff] %v1261_v25  ;;  %v1200_v53 = vadd.f32 %v2039_v34, %v1076_v49  ;;  %v1201_v54 = vadd.f32 %v2042_v35, %v1076_v49  ;;  %v1206_v48 = vadd.f32 %v2039_v34, %v1088_v37 }
 0x2a7   :  { %1330 = vst [vmem:[#allocation9 + $0x180] sm:$0xff] %v1266_v27  ;;  %1331 = vst [vmem:[#allocation9 + $0x188] sm:$0xff] %v1267_v52  ;;  %v1207_v50 = vadd.f32 %v2042_v35, %v1088_v37 }
 0x2a8   :  { %v1264_v55 = vmul.f32 %v1566_v26, %v1200_v53  ;;  %v1265_v58 = vmul.f32 %v1567_v56, %v1201_v54  ;;  %v1270_v63 = vmul.f32 %v1568_v22, %v1206_v48 }
 0x2a9   :  { %v1271_v4 = vmul.f32 %v1569_v3, %v1207_v50  ;;  %v1084_v8 = vpop.permute.xlu1 %1083  ;;  %v1096_v23 = vpop.permute.xlu0 %1095 }
 0x2aa   :  { %1328 = vst [vmem:[#allocation9 + $0x170] sm:$0xff] %v1264_v55  ;;  %1329 = vst [vmem:[#allocation9 + $0x178] sm:$0xff] %v1265_v58  ;;  %v1204_v9 = vadd.f32 %v2039_v34, %v1084_v8  ;;  %v1205_v10 = vadd.f32 %v2042_v35, %v1084_v8  ;;  %v1210_v11 = vadd.f32 %v2039_v34, %v1096_v23 }
 0x2ab   :  { %1334 = vst [vmem:[#allocation9 + $0x1a0] sm:$0xff] %v1270_v63  ;;  %1335 = vst [vmem:[#allocation9 + $0x1a8] sm:$0xff] %v1271_v4  ;;  %v1211_v12 = vadd.f32 %v2042_v35, %v1096_v23 }
 0x2ac   :  { %v1268_v15 = vmul.f32 %v1570_v57, %v1204_v9  ;;  %v1269_v61 = vmul.f32 %v1571_v60, %v1205_v10  ;;  %v1274_v59 = vmul.f32 %v1572_v17, %v1210_v11 }
 0x2ad   :  { %v1275_v19 = vmul.f32 %v1573_v18, %v1211_v12  ;;  %v1092_v20 = vpop.permute.xlu1 %1091  ;;  %v1104_v21 = vpop.permute.xlu0 %1103 }
 0x2ae   :  { %1332 = vst [vmem:[#allocation9 + $0x190] sm:$0xff] %v1268_v15  ;;  %1333 = vst [vmem:[#allocation9 + $0x198] sm:$0xff] %v1269_v61  ;;  %v1208_v24 = vadd.f32 %v2039_v34, %v1092_v20  ;;  %v1209_v7 = vadd.f32 %v2042_v35, %v1092_v20  ;;  %v1214_v29 = vadd.f32 %v2039_v34, %v1104_v21 }
 0x2af   :  { %1338 = vst [vmem:[#allocation9 + $0x1c0] sm:$0xff] %v1274_v59  ;;  %1339 = vst [vmem:[#allocation9 + $0x1c8] sm:$0xff] %v1275_v19  ;;  %v1215_v30 = vadd.f32 %v2042_v35, %v1104_v21 }
 0x2b0   :  { %v1272_v31 = vmul.f32 %v1574_v62, %v1208_v24  ;;  %v1273_v2 = vmul.f32 %v1575_v0, %v1209_v7  ;;  %v1278_v33 = vmul.f32 %v1576_v32, %v1214_v29 }
 0x2b1   :  { %v1279_v45 = vmul.f32 %v1577_v36, %v1215_v30  ;;  %v1100_v38 = vpop.permute.xlu1 %1099 }
 0x2b2   :  { %1336 = vst [vmem:[#allocation9 + $0x1b0] sm:$0xff] %v1272_v31  ;;  %1337 = vst [vmem:[#allocation9 + $0x1b8] sm:$0xff] %v1273_v2  ;;  %v1212_v39 = vadd.f32 %v2039_v34, %v1100_v38  ;;  %v1213_v40 = vadd.f32 %v2042_v35, %v1100_v38 }
 0x2b3   :  { %1342 = vst [vmem:[#allocation9 + $0x1e0] sm:$0xff] %v1278_v33  ;;  %1343 = vst [vmem:[#allocation9 + $0x1e8] sm:$0xff] %v1279_v45 }
 0x2b4   :  { %v1276_v44 = vmul.f32 %v1578_v41, %v1212_v39  ;;  %v1277_v42 = vmul.f32 %v1579_v46, %v1213_v40 }
 0x2b5   :  { %v1108_v28 = vpop.permute.xlu1 %1107 }
 0x2b6   :  { %1340 = vst [vmem:[#allocation9 + $0x1d0] sm:$0xff] %v1276_v44  ;;  %1341 = vst [vmem:[#allocation9 + $0x1d8] sm:$0xff] %v1277_v42  ;;  %v1216_v5 = vadd.f32 %v2039_v34, %v1108_v28  ;;  %v1217_v6 = vadd.f32 %v2042_v35, %v1108_v28 }
 0x2b8   :  { %v1280_v43 = vmul.f32 %v1580_v16, %v1216_v5  ;;  %v1281_v13 = vmul.f32 %v1581_v1, %v1217_v6 }
 0x2ba   :  { %1344 = vst [vmem:[#allocation9 + $0x1f0] sm:$0xff] %v1280_v43  ;;  %1345 = vst [vmem:[#allocation9 + $0x1f8] sm:$0xff] %v1281_v13 }
 0x2bb   :  { %1659 = shalt.err (!%p1656_p0)
}
 0x2bc   :  { %s1660_s14 = scalar_lea.hbm %s2104_s5, 8192 }
 0x2bd   :  { %p1661_p1 = scmp.ne.s32.totalorder %s2104_s5, %s1660_s14  ;;  %p1664_p2 = scmp.lt.u32.totalorder %s1660_s14, %s2104_s5 }
 0x2bf   :  { %p1666_p3 = pnand %p1664_p2, %p1661_p1 }
 0x2c1   :  { %1669 = shalt.err (!%p1666_p3)
}
 0x2c2   :  { %1357 = dma.vmem_to_hbm [thread:$0]  %s1352_s10, 8192, %s2104_s5, [#allocation5], %s1680_s1, %s1680_s1, %s1681_s17  }
 0x2c3   :  { %1674 = dma.done.wait [#allocation5], 8192  }
 0x2c4   :  { %1675 = vsyncadd [#allocation5], 4294959104 }
 0x2c5   :  { %1361 = vsyncpa [#allocation4], 1 }
 0x2c6   :  { %1362 = vsyncpa [#allocation7], 1 }
 0x2c7   :  { %1363 = vsyncpa [#allocation5], 1 }

</bundles_post_ra>
